<compile_context>
chip_gen: v7x
topology: tpu7x:2x2x1
jax: 0.10.0
libtpu: 0.0.40
codegen_flags: <defaults>
</compile_context>

<pallas_src>
import functools

import jax
import jax.numpy as jnp
from jax import lax
from jax.experimental import pallas as pl
from jax.experimental.pallas import tpu as pltpu


def _round_up(x, m):
    return (x + m - 1) // m * m


def _pick_divisor_tile(n, target):
    """Largest divisor of n that is <= target (falls back to n)."""
    for t in range(min(n, target), 0, -1):
        if n % t == 0:
            return t
    return n


def _pick_rows_tile(rows, target):
    """Largest divisor of rows <= target that keeps the block sublane-aligned."""
    for t in range(min(rows, target), 0, -1):
        if rows % t == 0 and (t % 8 == 0 or t == rows):
            return t
    return rows


# ----------------------------------------------------------------------------
# Kernel 1: 3x3 conv as a single im2col matmul per row strip (bf16 operands,
# f32 accumulation) + per-sample sum / sum-of-squares partial stats accumulated
# in a resident (1, 2, C_out_pad) output block.
# Grid = (N "parallel", n_row_strips "arbitrary").
# ----------------------------------------------------------------------------
def conv_stats_kernel(x_ref, w_ref, y_ref, stats_ref, *,
                      TH, W, C_in_pad, C_out_pad, KH, KW):
    t = pl.program_id(1)

    @pl.when(t == 0)
    def _():
        stats_ref[...] = jnp.zeros_like(stats_ref)

    # Top row of this output strip == top row of its input window (input is
    # already spatially padded by KH//2 in the wrapper).
    row0 = pl.multiple_of(t * TH, TH)

    # Build the (TH, W, KH*KW*C_in_pad) patch tensor in VMEM: 9 shifted taps
    # concatenated along the contraction axis -> one MXU matmul instead of 9.
    taps = []
    for ky in range(KH):
        for kx in range(KW):
            taps.append(x_ref[0, pl.ds(row0 + ky, TH), kx:kx + W, :])  # (TH, W, C_in_pad)
    patches = jnp.concatenate(taps, axis=-1)                           # (TH, W, K)
    patches = patches.reshape(TH * W, KH * KW * C_in_pad)              # (TH*W, K) bf16

    acc = jnp.dot(patches, w_ref[...],
                  preferred_element_type=jnp.float32)                  # (TH*W, C_out_pad) f32

    # bf16 intermediate (halves HBM traffic of pass-1 writeback / pass-2 read).
    y_ref[...] = acc.reshape(1, TH, W, C_out_pad).astype(y_ref.dtype)

    # Single lane-dense read-modify-write: row 0 = sum, row 1 = sum of squares.
    s1 = jnp.sum(acc, axis=0, keepdims=True)
    s2 = jnp.sum(acc * acc, axis=0, keepdims=True)
    stats_ref[...] += jnp.concatenate([s1, s2], axis=0)[None]          # (1, 2, C_out_pad)


# ----------------------------------------------------------------------------
# Kernel 2: folded BatchNorm (per-channel affine) + ReLU on lane-dense
# (TR, C_out_pad) tiles of the flattened activation. Pure memory-roofline pass.
# ----------------------------------------------------------------------------
def bn_relu_kernel(y_ref, ss_ref, o_ref):
    y = y_ref[...].astype(jnp.float32)                   # (TR, C_out_pad)
    out = y * ss_ref[0:1, :] + ss_ref[1:2, :]            # scale / shift rows
    o_ref[...] = jnp.maximum(out, 0.0)


def conv_bn_relu(x_nchw, w_oihw, gamma, beta, eps=1e-5):
    """Forward pass of the PyTorch `Conv2d` module (conv -> train-mode BN -> ReLU)."""
    N, C_in, H, W = x_nchw.shape
    C_out, _, KH, KW = w_oihw.shape
    pad = KH // 2

    C_in_pad = _round_up(max(C_in, 8), 8)
    C_out_pad = _round_up(max(C_out, 128), 128)          # lane-dense output channels
    K = KH * KW * C_in_pad

    # --- glue: layout conversion, channel/spatial padding, bf16 operands -----
    x = jnp.transpose(x_nchw, (0, 2, 3, 1))                               # NHWC
    x = jnp.pad(x, ((0, 0), (pad, pad), (pad, pad), (0, C_in_pad - C_in)))
    x = x.astype(jnp.bfloat16)
    Hp, Wp = H + 2 * pad, W + 2 * pad

    w = jnp.transpose(w_oihw, (2, 3, 1, 0))                               # HWIO
    w = jnp.pad(w, ((0, 0), (0, 0), (0, C_in_pad - C_in), (0, C_out_pad - C_out)))
    w = w.reshape(K, C_out_pad).astype(jnp.bfloat16)                      # (K, C_out_pad)

    # Row-strip height: aim for ~512 output rows per matmul (good MXU M dim,
    # fewer grid steps), bounded to a divisor of H.
    TH = _pick_divisor_tile(H, max(1, 512 // max(W, 1)))
    n_strips = H // TH

    kern = functools.partial(conv_stats_kernel, TH=TH, W=W, C_in_pad=C_in_pad,
                             C_out_pad=C_out_pad, KH=KH, KW=KW)
    y_conv, stats = pl.pallas_call(
        kern,
        out_shape=(jax.ShapeDtypeStruct((N, H, W, C_out_pad), jnp.bfloat16),
                   jax.ShapeDtypeStruct((N, 2, C_out_pad), jnp.float32)),
        grid_spec=pltpu.PrefetchScalarGridSpec(
            num_scalar_prefetch=0,
            grid=(N, n_strips),
            in_specs=[
                # Whole padded image stays resident across the strip axis (fine
                # at these sizes; switch to halo'd row-strip DMA for huge H/W).
                pl.BlockSpec((1, Hp, Wp, C_in_pad), lambda n, t: (n, 0, 0, 0)),
                pl.BlockSpec((K, C_out_pad), lambda n, t: (0, 0)),
            ],
            out_specs=[
                pl.BlockSpec((1, TH, W, C_out_pad), lambda n, t: (n, t, 0, 0)),
                # per-sample partial stats -> safe with a "parallel" batch axis
                pl.BlockSpec((1, 2, C_out_pad), lambda n, t: (n, 0, 0)),
            ],
        ),
        compiler_params=pltpu.CompilerParams(
            dimension_semantics=("parallel", "arbitrary"),
            vmem_limit_bytes=32 * 1024 * 1024),
    )(x, w)

    # --- per-channel train-mode BN parameters from the partial sums ----------
    count = jnp.float32(N * H * W)
    total = jnp.sum(stats, axis=0)                          # (2, C_out_pad)
    mean = total[0] / count
    var = jnp.maximum(total[1] / count - mean * mean, 0.0)  # clamp: cancellation safety
    inv_std = lax.rsqrt(var + jnp.float32(eps))
    gamma_p = jnp.zeros((C_out_pad,), jnp.float32).at[:C_out].set(gamma.astype(jnp.float32))
    beta_p = jnp.zeros((C_out_pad,), jnp.float32).at[:C_out].set(beta.astype(jnp.float32))
    scale = gamma_p * inv_std
    shift = beta_p - mean * scale
    ss = jnp.stack([scale, shift], axis=0)                  # (2, C_out_pad)

    # --- pass 2: lane-dense elementwise BN + ReLU -----------------------------
    rows = N * H * W
    TR = _pick_rows_tile(rows, 1024)                        # big tiles ~ HBM roofline
    y2d = y_conv.reshape(rows, C_out_pad)                   # contiguous, free reshape

    out2d = pl.pallas_call(
        bn_relu_kernel,
        out_shape=jax.ShapeDtypeStruct((rows, C_out_pad), jnp.float32),
        grid_spec=pltpu.PrefetchScalarGridSpec(
            num_scalar_prefetch=0,
            grid=(rows // TR,),
            in_specs=[
                pl.BlockSpec((TR, C_out_pad), lambda i: (i, 0)),
                pl.BlockSpec((2, C_out_pad), lambda i: (0, 0)),
            ],
            out_specs=pl.BlockSpec((TR, C_out_pad), lambda i: (i, 0)),
        ),
        compiler_params=pltpu.CompilerParams(
            dimension_semantics=("parallel",),
            vmem_limit_bytes=32 * 1024 * 1024),
    )(y2d, ss)

    out = out2d.reshape(N, H, W, C_out_pad)[..., :C_out]
    return jnp.transpose(out, (0, 3, 1, 2))                 # back to NCHW


# ----------------------------------------------------------------------------
# Pure-JAX reference (PyTorch Conv2d -> BatchNorm2d(train) -> ReLU), f32 math.
# ----------------------------------------------------------------------------
def ref_forward(x_nchw, w_oihw, gamma, beta, eps=1e-5):
    pad = w_oihw.shape[2] // 2
    y = lax.conv_general_dilated(
        x_nchw, w_oihw, window_strides=(1, 1),
        padding=((pad, pad), (pad, pad)),
        dimension_numbers=("NCHW", "OIHW", "NCHW"))
    mean = y.mean(axis=(0, 2, 3))
    var = y.var(axis=(0, 2, 3))
    yn = (y - mean[None, :, None, None]) * lax.rsqrt(var + eps)[None, :, None, None]
    yn = yn * gamma[None, :, None, None] + beta[None, :, None, None]
    return jnp.maximum(yn, 0.0)


if __name__ == "__main__":
    key = jax.random.PRNGKey(0)
    k_x, k_w = jax.random.split(key)

    N, C_in, C_out, H, W = 2, 4, 8, 16, 16
    KH = KW = 3

    x = jax.random.normal(k_x, (N, C_in, H, W), dtype=jnp.float32)
    fan_in = C_in * KH * KW
    w = jax.random.normal(k_w, (C_out, C_in, KH, KW), dtype=jnp.float32) / jnp.sqrt(fan_in)
    # BatchNorm2d default init: weight (gamma) = 1, bias (beta) = 0.
    gamma = jnp.ones((C_out,), dtype=jnp.float32)
    beta = jnp.zeros((C_out,), dtype=jnp.float32)

    out = jax.block_until_ready(conv_bn_relu(x, w, gamma, beta))

    # Reference: apply the same bf16 operand rounding the MXU sees, f32 math.
    x_r = x.astype(jnp.bfloat16).astype(jnp.float32)
    w_r = w.astype(jnp.bfloat16).astype(jnp.float32)
    ref = ref_forward(x_r, w_r, gamma, beta)

    assert out.shape == (N, C_out, H, W), out.shape
    max_err = float(jnp.max(jnp.abs(out - ref)))
    assert jnp.allclose(out, ref, atol=2e-2, rtol=2e-2), max_err

    print("KERNEL_OK")
</pallas_src>

<mosaic_0001>
module attributes {stable_mosaic.version = 11 : i64} {
  func.func @conv_stats_kernel(%arg0: i32, %arg1: i32, %arg2: memref<1x18x18x8xbf16, #tpu.memory_space<vmem>>, %arg3: memref<72x128xbf16, #tpu.memory_space<vmem>>, %arg4: memref<1x16x16x128xbf16, #tpu.memory_space<vmem>>, %arg5: memref<1x2x128xf32, #tpu.memory_space<vmem>>) attributes {dimension_semantics = [#tpu.dimension_semantics<parallel>, #tpu.dimension_semantics<arbitrary>], iteration_bounds = array<i64: 2, 1>, scalar_prefetch = 0 : i64, scratch_operands = 0 : i64, tpu.core_type = #tpu.core_type<tc>, window_params = [{transform_indices = @transform_0, window_bounds = array<i64: 1, 18, 18, 8>}, {pipeline_mode = #tpu.pipeline_mode<synchronous>, transform_indices = @transform_1, window_bounds = array<i64: 72, 128>}, {transform_indices = @transform_2, window_bounds = array<i64: 1, 16, 16, 128>}, {transform_indices = @transform_3, window_bounds = array<i64: 1, 2, 128>}]} {
    %c0_i32 = arith.constant 0 : i32
    %0 = arith.cmpi eq, %arg1, %c0_i32 : i32
    %1 = arith.extui %0 : i1 to i32
    %c0_i32_0 = arith.constant 0 : i32
    %2 = arith.cmpi ne, %1, %c0_i32_0 : i32
    scf.if %2 {
      %cst_46 = arith.constant 0.000000e+00 : f32
      %58 = vector.broadcast %cst_46 : f32 to vector<1x2x128xf32>
      %c0_47 = arith.constant 0 : index
      %c0_48 = arith.constant 0 : index
      %c0_49 = arith.constant 0 : index
      %59 = vector.load %arg5[%c0_47, %c0_48, %c0_49] : memref<1x2x128xf32, #tpu.memory_space<vmem>>, vector<1x2x128xf32>
      tpu.vector_store %arg5[%c0_47, %c0_48, %c0_49], %58 {strides = array<i32>} : memref<1x2x128xf32, #tpu.memory_space<vmem>>, vector<1x2x128xf32>,
    } else {
    }
    %c16_i32 = arith.constant 16 : i32
    %3 = arith.muli %arg1, %c16_i32 : i32
    %4 = tpu.assume_multiple %3, 16 : i32
    %c0_i32_1 = arith.constant 0 : i32
    %5 = arith.addi %4, %c0_i32_1 : i32
    %c0 = arith.constant 0 : index
    %6 = arith.index_cast %5 : i32 to index
    %c0_2 = arith.constant 0 : index
    %c0_3 = arith.constant 0 : index
    %7 = vector.load %arg2[%c0, %6, %c0_2, %c0_3] : memref<1x18x18x8xbf16, #tpu.memory_space<vmem>>, vector<1x16x16x8xbf16>
    %8 = vector.shape_cast %7 : vector<1x16x16x8xbf16> to vector<16x16x8xbf16>
    %c0_i32_4 = arith.constant 0 : i32
    %9 = arith.addi %4, %c0_i32_4 : i32
    %c0_5 = arith.constant 0 : index
    %10 = arith.index_cast %9 : i32 to index
    %c1 = arith.constant 1 : index
    %c0_6 = arith.constant 0 : index
    %11 = vector.load %arg2[%c0_5, %10, %c1, %c0_6] : memref<1x18x18x8xbf16, #tpu.memory_space<vmem>>, vector<1x16x16x8xbf16>
    %12 = vector.shape_cast %11 : vector<1x16x16x8xbf16> to vector<16x16x8xbf16>
    %c0_i32_7 = arith.constant 0 : i32
    %13 = arith.addi %4, %c0_i32_7 : i32
    %c0_8 = arith.constant 0 : index
    %14 = arith.index_cast %13 : i32 to index
    %c2 = arith.constant 2 : index
    %c0_9 = arith.constant 0 : index
    %15 = vector.load %arg2[%c0_8, %14, %c2, %c0_9] : memref<1x18x18x8xbf16, #tpu.memory_space<vmem>>, vector<1x16x16x8xbf16>
    %16 = vector.shape_cast %15 : vector<1x16x16x8xbf16> to vector<16x16x8xbf16>
    %c1_i32 = arith.constant 1 : i32
    %17 = arith.addi %4, %c1_i32 : i32
    %c0_10 = arith.constant 0 : index
    %18 = arith.index_cast %17 : i32 to index
    %c0_11 = arith.constant 0 : index
    %c0_12 = arith.constant 0 : index
    %19 = vector.load %arg2[%c0_10, %18, %c0_11, %c0_12] : memref<1x18x18x8xbf16, #tpu.memory_space<vmem>>, vector<1x16x16x8xbf16>
    %20 = vector.shape_cast %19 : vector<1x16x16x8xbf16> to vector<16x16x8xbf16>
    %c1_i32_13 = arith.constant 1 : i32
    %21 = arith.addi %4, %c1_i32_13 : i32
    %c0_14 = arith.constant 0 : index
    %22 = arith.index_cast %21 : i32 to index
    %c1_15 = arith.constant 1 : index
    %c0_16 = arith.constant 0 : index
    %23 = vector.load %arg2[%c0_14, %22, %c1_15, %c0_16] : memref<1x18x18x8xbf16, #tpu.memory_space<vmem>>, vector<1x16x16x8xbf16>
    %24 = vector.shape_cast %23 : vector<1x16x16x8xbf16> to vector<16x16x8xbf16>
    %c1_i32_17 = arith.constant 1 : i32
    %25 = arith.addi %4, %c1_i32_17 : i32
    %c0_18 = arith.constant 0 : index
    %26 = arith.index_cast %25 : i32 to index
    %c2_19 = arith.constant 2 : index
    %c0_20 = arith.constant 0 : index
    %27 = vector.load %arg2[%c0_18, %26, %c2_19, %c0_20] : memref<1x18x18x8xbf16, #tpu.memory_space<vmem>>, vector<1x16x16x8xbf16>
    %28 = vector.shape_cast %27 : vector<1x16x16x8xbf16> to vector<16x16x8xbf16>
    %c2_i32 = arith.constant 2 : i32
    %29 = arith.addi %4, %c2_i32 : i32
    %c0_21 = arith.constant 0 : index
    %30 = arith.index_cast %29 : i32 to index
    %c0_22 = arith.constant 0 : index
    %c0_23 = arith.constant 0 : index
    %31 = vector.load %arg2[%c0_21, %30, %c0_22, %c0_23] : memref<1x18x18x8xbf16, #tpu.memory_space<vmem>>, vector<1x16x16x8xbf16>
    %32 = vector.shape_cast %31 : vector<1x16x16x8xbf16> to vector<16x16x8xbf16>
    %c2_i32_24 = arith.constant 2 : i32
    %33 = arith.addi %4, %c2_i32_24 : i32
    %c0_25 = arith.constant 0 : index
    %34 = arith.index_cast %33 : i32 to index
    %c1_26 = arith.constant 1 : index
    %c0_27 = arith.constant 0 : index
    %35 = vector.load %arg2[%c0_25, %34, %c1_26, %c0_27] : memref<1x18x18x8xbf16, #tpu.memory_space<vmem>>, vector<1x16x16x8xbf16>
    %36 = vector.shape_cast %35 : vector<1x16x16x8xbf16> to vector<16x16x8xbf16>
    %c2_i32_28 = arith.constant 2 : i32
    %37 = arith.addi %4, %c2_i32_28 : i32
    %c0_29 = arith.constant 0 : index
    %38 = arith.index_cast %37 : i32 to index
    %c2_30 = arith.constant 2 : index
    %c0_31 = arith.constant 0 : index
    %39 = vector.load %arg2[%c0_29, %38, %c2_30, %c0_31] : memref<1x18x18x8xbf16, #tpu.memory_space<vmem>>, vector<1x16x16x8xbf16>
    %40 = vector.shape_cast %39 : vector<1x16x16x8xbf16> to vector<16x16x8xbf16>
    %41 = tpu.concatenate %8, %12, %16, %20, %24, %28, %32, %36, %40 in 2 : vector<16x16x8xbf16>, vector<16x16x8xbf16>, vector<16x16x8xbf16>, vector<16x16x8xbf16>, vector<16x16x8xbf16>, vector<16x16x8xbf16>, vector<16x16x8xbf16>, vector<16x16x8xbf16>, vector<16x16x8xbf16> -> vector<16x16x72xbf16>
    %42 = vector.shape_cast %41 : vector<16x16x72xbf16> to vector<256x72xbf16>
    %c0_32 = arith.constant 0 : index
    %c0_33 = arith.constant 0 : index
    %43 = vector.load %arg3[%c0_32, %c0_33] : memref<72x128xbf16, #tpu.memory_space<vmem>>, vector<72x128xbf16>
    %cst = arith.constant dense<0.000000e+00> : vector<256x128xf32>
    %44 = tpu.matmul %42, %43, %cst {dimension_numbers = #tpu.dot_dimension_numbers<[1], [0], [0], [1], [0, 0, 1, 1], [], []>} : vector<256x72xbf16>, vector<72x128xbf16>, vector<256x128xf32> -> vector<256x128xf32>
    %45 = vector.shape_cast %44 : vector<256x128xf32> to vector<1x16x16x128xf32>
    %46 = arith.truncf %45 : vector<1x16x16x128xf32> to vector<1x16x16x128xbf16>
    %c0_34 = arith.constant 0 : index
    %c0_35 = arith.constant 0 : index
    %c0_36 = arith.constant 0 : index
    %c0_37 = arith.constant 0 : index
    %47 = vector.load %arg4[%c0_34, %c0_35, %c0_36, %c0_37] : memref<1x16x16x128xbf16, #tpu.memory_space<vmem>>, vector<1x16x16x128xbf16>
    tpu.vector_store %arg4[%c0_34, %c0_35, %c0_36, %c0_37], %46 {strides = array<i32>} : memref<1x16x16x128xbf16, #tpu.memory_space<vmem>>, vector<1x16x16x128xbf16>,
    %cst_38 = arith.constant dense<0.000000e+00> : vector<128xf32>
    %48 = vector.multi_reduction <add>, %44, %cst_38 [0] : vector<256x128xf32> to vector<128xf32>
    %49 = vector.shape_cast %48 : vector<128xf32> to vector<1x128xf32>
    %50 = arith.mulf %44, %44 : vector<256x128xf32>
    %cst_39 = arith.constant dense<0.000000e+00> : vector<128xf32>
    %51 = vector.multi_reduction <add>, %50, %cst_39 [0] : vector<256x128xf32> to vector<128xf32>
    %52 = vector.shape_cast %51 : vector<128xf32> to vector<1x128xf32>
    %c0_40 = arith.constant 0 : index
    %c0_41 = arith.constant 0 : index
    %c0_42 = arith.constant 0 : index
    %53 = vector.load %arg5[%c0_40, %c0_41, %c0_42] : memref<1x2x128xf32, #tpu.memory_space<vmem>>, vector<1x2x128xf32>
    %54 = tpu.concatenate %49, %52 in 0 : vector<1x128xf32>, vector<1x128xf32> -> vector<2x128xf32>
    %55 = vector.shape_cast %54 : vector<2x128xf32> to vector<1x2x128xf32>
    %56 = arith.addf %53, %55 : vector<1x2x128xf32>
    %c0_43 = arith.constant 0 : index
    %c0_44 = arith.constant 0 : index
    %c0_45 = arith.constant 0 : index
    %57 = vector.load %arg5[%c0_43, %c0_44, %c0_45] : memref<1x2x128xf32, #tpu.memory_space<vmem>>, vector<1x2x128xf32>
    tpu.vector_store %arg5[%c0_43, %c0_44, %c0_45], %56 {strides = array<i32>} : memref<1x2x128xf32, #tpu.memory_space<vmem>>, vector<1x2x128xf32>,
    return
  }
  func.func @transform_0(%arg0: i32, %arg1: i32) -> (i32, i32, i32, i32) {
    %c0_i32 = arith.constant 0 : i32
    %c0_i32_0 = arith.constant 0 : i32
    %c0_i32_1 = arith.constant 0 : i32
    %c0_i32_2 = arith.constant 0 : i32
    return %arg0, %c0_i32, %c0_i32_0, %c0_i32_1 : i32, i32, i32, i32
  }
  func.func @transform_1(%arg0: i32, %arg1: i32) -> (i32, i32) {
    %c0_i32 = arith.constant 0 : i32
    %c0_i32_0 = arith.constant 0 : i32
    %c0_i32_1 = arith.constant 0 : i32
    return %c0_i32, %c0_i32_0 : i32, i32
  }
  func.func @transform_2(%arg0: i32, %arg1: i32) -> (i32, i32, i32, i32) {
    %c0_i32 = arith.constant 0 : i32
    %c0_i32_0 = arith.constant 0 : i32
    %c0_i32_1 = arith.constant 0 : i32
    return %arg0, %arg1, %c0_i32, %c0_i32_0 : i32, i32, i32, i32
  }
  func.func @transform_3(%arg0: i32, %arg1: i32) -> (i32, i32, i32) {
    %c0_i32 = arith.constant 0 : i32
    %c0_i32_0 = arith.constant 0 : i32
    %c0_i32_1 = arith.constant 0 : i32
    return %arg0, %c0_i32, %c0_i32_0 : i32, i32, i32
  }
}

</mosaic_0001>

<bundles_post_ra>
// kernel: tpu_custom_call.1
= control target key start
LH: loop header
LB: loop body
LE: loop exit
PB: predicated region body
PF: predicated region fallthrough
CT: control target
= control target key end

     0   :  { %9 = vsyncpa [#allocation3], 0  ;;  %s4990_s0 = inlined_call_operand.vmem [shape: bf16[2,18,18,8], index: 0, kind: input, shape index: {}]   ;;  %s4991_s1 = inlined_call_operand.vmem [shape: bf16[72,128], index: 1, kind: input, shape index: {}]   ;;  %s4992_s2 = inlined_call_operand.hbm [shape: bf16[2,16,16,128], index: 2, kind: output, shape index: {0}]   ;;  %s4993_s3 = inlined_call_operand.hbm [shape: f32[2,2,128], index: 3, kind: output, shape index: {1}]  }
   0x1   :  { %11 = vsyncpa [#allocation3 + $0x1], 0 }
   0x2   :  { %12 = vsyncpa [#allocation5], 0 }
   0x3   :  { %14 = vsyncpa [#allocation5 + $0x1], 0  ;;  %s3737_s12 = smov 0   ;;  %s3739_s13 = smov 0  }
   0x4   :  { %s3741_s14 = smov 0   ;;  %s3743_s15 = smov 0  }
   0x5   :  { %s3745_s16 = smov 0   ;;  %s3747_s17 = smov 0  }
   0x6 LB: > { %s2830_s18 = sadd.s32 4294967295, %s3703_s17   ;;  %s2831_s19 = sadd.s32 4294967294, %s3703_s17   ;;  %s3703_s17 = sphi %s3747_s17, %s20_s17   ;;  %s3699_s16 = sphi %s3745_s16, %s5000_s16   ;;  %s3695_s15 = sphi %s3743_s15, %s4999_s15   ;;  %s3691_s14 = sphi %s3741_s14, %s4998_s14   ;;  %s3687_s13 = sphi %s3739_s13, %s4997_s13   ;;  %s3683_s12 = sphi %s3737_s12, %s4996_s12  }
   0x7   : > { %s32_s20 = sadd.s32 1, %s3699_s16  ;;  %s88_s21 = sadd.s32 1, %s3691_s14 }
   0x8   : > { %p34_p0 = scmp.ge.s32.totalorder %s32_s20, 2  ;;  %p98_p1 = scmp.ne.s32.totalorder %s3691_s14, %s3687_s13 }
   0x9   : > { %p99_p2 = scmp.eq.s32.totalorder %s2830_s18, 1  ;;  %p104_p3 = scmp.ne.s32.totalorder %s3687_s13, %s3683_s12 }
   0xa   : > { %s5002_s20 = smov (%p34_p0, %s32_s20), 0  ;;  %p105_p5 = scmp.eq.s32.totalorder %s2831_s19, 1 }
   0xb   : > { %p3777_p4 = por %p99_p2, %p98_p1  ;;  %s83_s23 = ssub.s32 %s3699_s16, %s5002_s20 }
   0xc   : > { %p2834_p6 = scmp.ge.s32.totalorder %s3703_s17, 1  ;;  %p86_p7 = scmp.eq.s32.totalorder %s83_s23, 0 }
   0xd   : > { %p3784_p8 = por %p105_p5, %p104_p3  ;;  %p160_p9 = scmp.lt.s32.totalorder %s3703_s17, 3 }
   0xe   : > { %s3790_s25 = scalar_select %p86_p7, %s3691_s14, %s88_s21  }
   0xf   : > { %p161_p10 = pnand %p2834_p6, %p160_p9 }
  0x10   : > { %p189_p11 = scmp.lt.s32.totalorder (!%p161_p10), %s3695_s15, 1  ;;  %vm806_vm0 = vcmask (!%p161_p10), 1046528   ;;  %s3705_s4 = smov (!%p161_p10), 24   ;;  %vm533_vm1 = vsmask.f32 (!%p161_p10), 7424  ;;  %v3518_v31 = vld [vmem:[%s4991_s1] sm:$0xff] (!%p161_p10)  }
  0x11   : > { %164 = sbr.rel (%p161_p10) target bundleno = 668 (0x29c), region = 28  ;;  %s3706_s7 = smov (!%p161_p10), 40   ;;  %3319 = vmatprep.subr.bf16.mxu0 (!%p161_p10), %v3518_v31  ;;  %3361 = vmatprep.subr.bf16.mxu1 (!%p161_p10), %v3518_v31  ;;  %v3521_v58 = vld [vmem:[%s4991_s1 + $0x8] sm:$0xff] (!%p161_p10)   ;;  %v3524_v63 = vld [vmem:[%s4991_s1 + $0x10] sm:$0xff] (!%p161_p10)   ;;  %vm2244_vm2 = vcmask (!%p161_p10), 1043456   ;;  %vm1911_vm3 = vcmask (!%p161_p10), 64512  }
  0x12   : > { %s3707_s8 = smov (!%p161_p10), 16   ;;  %3320 = vmatpush3.bf16.msra.mxu0 (!%p161_p10), %v3518_v31  ;;  %3366 = vmatpush3.bf16.msra.mxu1 (!%p161_p10), %v3518_v31  ;;  %s3708_s19 = smov (!%p161_p10), 8   ;;  %vm1944_vm4 = vcmask (!%p161_p10), 130048   ;;  %vm1977_vm5 = vcmask (!%p161_p10), 195584   ;;  %vm2010_vm6 = vcmask (!%p161_p10), 261120   ;;  %vm2043_vm7 = vcmask (!%p161_p10), 326656  }
  0x13   : > { %3321 = vmatprep.subr.bf16.mxu0 (!%p161_p10), %v3521_v58  ;;  %3362 = vmatprep.subr.bf16.mxu1 (!%p161_p10), %v3521_v58  ;;  %s3711_s28 = smov (!%p161_p10), 56   ;;  %s3712_s29 = smov (!%p161_p10), 64   ;;  %vm2076_vm8 = vcmask (!%p161_p10), 392192   ;;  %vm2109_vm9 = vcmask (!%p161_p10), 457728   ;;  %vm2142_vm10 = vcmask (!%p161_p10), 523264   ;;  %vm2211_vm11 = vcmask (!%p161_p10), 588800  }
  0x14   : > { %s3202_s10 = sshll.u32 (!%p161_p10), %s3695_s15, 11 }
  0x15   : > { %s4903_s21 = scalar_lea.hbm (!%p161_p10), %s4992_s2, %s3202_s10 }
  0x16   : > { %3322 = vmatpush3.bf16.msra.mxu0 (!%p161_p10), %v3521_v58  ;;  %3367 = vmatpush3.bf16.msra.mxu1 (!%p161_p10), %v3521_v58 }
  0x17   : > { %3323 = vmatprep.subr.bf16.mxu0 (!%p161_p10), %v3524_v63  ;;  %3363 = vmatprep.subr.bf16.mxu1 (!%p161_p10), %v3524_v63 }
  0x18   : > { %s190_s26 = scalar_select %p189_p11, %s3695_s15, 1 }
  0x1a   : > { %s3373_s27 = smul.u32 216, %s190_s26  ;;  %3324 = vmatpush3.bf16.msra.mxu0 %v3524_v63  ;;  %3368 = vmatpush3.bf16.msra.mxu1 %v3524_v63  ;;  %s3709_s26 = smov 32  }
  0x1c   : > { %s3797_s30 = scalar_lea.vmem %s4990_s0, %s3373_s27  ;;  %s3710_s27 = smov 48  }
  0x1d   : > { %v2840_v0 = vld [vmem:[%s3797_s30 + $0x18] sm:$0xf]  ;;  %v2841_v1 = vld [vmem:[%s3797_s30 + $0x1c] sm:$0xf]  ;;  %v2838_v5 = vld [vmem:[%s3797_s30 + $0xc] sm:$0xf] }
  0x1e   : > { %v2887_v2 = vld [vmem:[%s3797_s30 + $0x18] sm:$0xe]  ;;  %v3802_v3 = vcombine.low %v2840_v0, %v2841_v1  ;;  %v2839_v6 = vld [vmem:[%s3797_s30 + $0x10] sm:$0xf]  ;;  %v2886_v7 = vld [vmem:[%s3797_s30 + $0xc] sm:$0xe] }
  0x1f   : > { %v3047_v4 = vcombine.low %v2887_v2, %v2841_v1  ;;  %v3807_v8 = vcombine.low %v2838_v5, %v2839_v6  ;;  %v3046_v9 = vcombine.low %v2886_v7, %v2839_v6  ;;  %v3810_v10 = vld [vmem:[%s3797_s30 + $0x14] ss:$0 sps:$4 sm:$0x11]   ;;  %v206_v12 = vld [vmem:[%s3797_s30 + $0x4] sm:$0xf] }
  0x20   : > { %969 = vrot.lane.b32.xlu1 %v3802_v3, %s3705_s4  ;;  %v1062_v11 = vshll.u32 %v3802_v3, 16  ;;  %v1320_v15 = vrot.slane %v3810_v10, 1  ;;  %v253_v16 = vld [vmem:[%s3797_s30] sm:$0xe]  ;;  %v1060_v21 = vshrl.u32 %v3802_v3, 16  ;;  %v1055_v61 = vshll.u32 %v3810_v10, 16 }
  0x21   : > { %967 = vrot.lane.b32.xlu0 %v3807_v8, %s3705_s4  ;;  %v1050_v13 = vshll.u32 %v3807_v8, 16  ;;  %v1319_v14 = vrot.slane %v3046_v9, 1  ;;  %v1322_v17 = vrot.slane %v3047_v4, 1  ;;  %v3449_v18 = vld [vmem:[%s3797_s30 + $0x8] ss:$0 sps:$4 sm:$0x11]   ;;  %v2998_v19 = vcombine.low %v253_v16, %v206_v12 }
  0x22   : > { %v205_v20 = vld [vmem:[%s3797_s30] sm:$0xf]  ;;  %v207_v24 = vld [vmem:[%s3797_s30 + $0xc] sm:$0xf]  ;;  %v208_v25 = vld [vmem:[%s3797_s30 + $0x10] sm:$0xf] }
  0x23   : > { %v1321_v22 = vsel %vm806_vm0, %v1319_v14, %v1320_v15  ;;  %v3825_v23 = vcombine.low %v205_v20, %v206_v12  ;;  %v807_v26 = vrot.slane %v2998_v19, 1  ;;  %v808_v27 = vrot.slane %v3449_v18, 1  ;;  %v254_v28 = vld [vmem:[%s3797_s30 + $0xc] sm:$0xe]  ;;  %v2904_v44 = vld [vmem:[%s3797_s30 + $0x24] sm:$0xf] }
  0x24   : > { %v3830_v29 = vcombine.low %v207_v24, %v208_v25  ;;  %v542_v30 = vshll.u32 %v3449_v18, 16  ;;  %v3453_v32 = vld [vmem:[%s3797_s30 + $0x14] ss:$0 sps:$4 sm:$0x11]   ;;  %v2999_v33 = vcombine.low %v254_v28, %v208_v25  ;;  %v1064_v36 = vrot.slane %v1062_v11, 1 }
  0x25   : > { %1367 = vrot.lane.b32.xlu0 %v1321_v22, %s3706_s7  ;;  %v535_v34 = vshrl.u32 %v3825_v23, 16  ;;  %v537_v35 = vshll.u32 %v3825_v23, 16  ;;  %v809_v37 = vsel %vm806_vm0, %v807_v26, %v808_v27  ;;  %v3455_v39 = vld [vmem:[%s3797_s30 + $0x20] ss:$0 sps:$4 sm:$0x11]   ;;  %v811_v41 = vrot.slane %v3453_v32, 1 }
  0x26   : > { %v544_v38 = vrot.slane %v542_v30, 1  ;;  %855 = vrot.lane.b32.xlu1 %v809_v37, %s3707_s8  ;;  %v810_v40 = vrot.slane %v2999_v33, 1  ;;  %v547_v43 = vshrl.u32 %v3830_v29, 16  ;;  %v1323_v45 = vrot.slane %v3455_v39, 1  ;;  %v3846_v49 = vld [vmem:[%s3797_s30 + $0x28] sm:$0xf] }
  0x27   : > { %v539_v42 = vrot.slane %v537_v35, 1  ;;  %v549_v46 = vshll.u32 %v3830_v29, 16  ;;  %v554_v47 = vshll.u32 %v3453_v32, 16  ;;  %v1067_v48 = vshll.u32 %v3455_v39, 16  ;;  %v2902_v54 = vld [vmem:[%s3797_s30 + $0x18] sm:$0xf] }
  0x28   : > { %v812_v50 = vsel %vm806_vm0, %v810_v40, %v811_v41  ;;  %v1048_v52 = vshrl.u32 %v3807_v8, 16  ;;  %v1052_v53 = vrot.slane %v1050_v13, 1  ;;  %v3852_v57 = vld [vmem:[%s3797_s30 + $0x1c] sm:$0xf]  ;;  %v1065_v60 = vor.u32 %v1064_v36, %v1060_v21  ;;  %v2950_v8 = vld [vmem:[%s3797_s30 + $0x18] sm:$0xe] }
  0x29   : > { %v540_v51 = vor.u32 %v539_v42, %v535_v34  ;;  %v551_v55 = vrot.slane %v549_v46, 1  ;;  %v556_v56 = vrot.slane %v554_v47, 1  ;;  %v3063_v62 = vcombine.low %v2904_v44, %v3846_v49  ;;  %v3868_v4 = vld [vmem:[%s3797_s30 + $0x2c] ss:$0 sps:$4 sm:$0x11]  }
  0x2a   : > { %857 = vrot.lane.b32.xlu1 %v812_v50, %s3707_s8  ;;  %v1324_v0 = vsel %vm806_vm0, %v1322_v17, %v1323_v45  ;;  %v1069_v2 = vrot.slane %v1067_v48, 1  ;;  %v3062_v3 = vcombine.low %v2902_v54, %v3852_v57  ;;  %v1053_v5 = vor.u32 %v1052_v53, %v1048_v52  ;;  %v3872_v9 = vld [vmem:[%s3797_s30 + $0x20] ss:$0 sps:$4 sm:$0x11]   ;;  %v209_v14 = vld [vmem:[%s3797_s30 + $0x18] sm:$0xf] }
  0x2b   : > { %v545_v59 = vsel %vm533_vm1, %v540_v51, %v544_v38  ;;  %v552_v1 = vor.u32 %v551_v55, %v547_v43  ;;  %v1057_v6 = vrot.slane %v1055_v61, 1  ;;  %v1574_v7 = vshll.u32 %v3063_v62, 16  ;;  %v3879_v16 = vld [vmem:[%s3797_s30 + $0x1c] sm:$0xf]  ;;  %v211_v26 = vld [vmem:[%s3797_s30 + $0x24] sm:$0xf] }
  0x2c   : > { %726 = vrot.lane.b32.xlu0 %v545_v59, %s3708_s19  ;;  %v1562_v11 = vshll.u32 %v3062_v3, 16  ;;  %v1572_v12 = vshrl.u32 %v3063_v62, 16  ;;  %v1579_v13 = vshll.u32 %v3868_v4, 16  ;;  %v3529_v17 = vld [vmem:[%s4991_s1 + $0x18] sm:$0xff]   ;;  %v1070_v18 = vsel %vm533_vm1, %v1065_v60, %v1069_v2  ;;  %v212_v27 = vld [vmem:[%s3797_s30 + $0x28] sm:$0xf] }
  0x2d   : > { %v557_v10 = vsel %vm533_vm1, %v552_v1, %v556_v56  ;;  %v1576_v15 = vrot.slane %v1574_v7, 1  ;;  %v1560_v19 = vshrl.u32 %v3062_v3, 16  ;;  %v3887_v20 = vcombine.low %v209_v14, %v3879_v16  ;;  %v3890_v21 = vld [vmem:[%s3797_s30 + $0x20] ss:$0 sps:$4 sm:$0x11]   ;;  %3325 = vmatprep.subr.bf16.mxu0 %v3529_v17  ;;  %3364 = vmatprep.subr.bf16.mxu1 %v3529_v17 }
  0x2e   : > { %1369 = vrot.lane.b32.xlu1 %v1324_v0, %s3706_s7  ;;  %v1058_v22 = vsel %vm533_vm1, %v1053_v5, %v1057_v6  ;;  %v1564_v24 = vrot.slane %v1562_v11, 1  ;;  %v1567_v25 = vshll.u32 %v3872_v9, 16  ;;  %v3094_v28 = vcombine.low %v2950_v8, %v3852_v57  ;;  %v3465_v37 = vld [vmem:[%s3797_s30 + $0x2c] ss:$0 sps:$4 sm:$0x11]   ;;  %3326 = vmatpush3.bf16.msra.mxu0 %v3529_v17 }
  0x2f   : > { %v561_v30 = vshll.u32 %v3887_v20, 16  ;;  %v1577_v31 = vor.u32 %v1576_v15, %v1572_v12  ;;  %v1581_v32 = vrot.slane %v1579_v13, 1  ;;  %v566_v33 = vshll.u32 %v3890_v21, 16  ;;  %v2951_v41 = vld [vmem:[%s3797_s30 + $0x24] sm:$0xe]  ;;  %3369 = vmatpush3.bf16.msra.mxu1 %v3529_v17 }
  0x30   : > { %728 = vrot.lane.b32.xlu0 %v557_v10, %s3708_s19  ;;  %v3900_v34 = vcombine.low %v211_v26, %v212_v27  ;;  %v559_v35 = vshrl.u32 %v3887_v20, 16  ;;  %v1565_v38 = vor.u32 %v1564_v24, %v1560_v19  ;;  %v1569_v39 = vrot.slane %v1567_v25, 1  ;;  %v256_v46 = vld [vmem:[%s3797_s30 + $0x24] sm:$0xe]  ;;  %v255_v52 = vld [vmem:[%s3797_s30 + $0x18] sm:$0xe] }
  0x31   : > { %v563_v36 = vrot.slane %v561_v30, 1  ;;  %v1582_v42 = vsel %vm533_vm1, %v1577_v31, %v1581_v32  ;;  %v568_v43 = vrot.slane %v566_v33, 1  ;;  %v1831_v44 = vrot.slane %v3094_v28, 1  ;;  %v2844_v55 = vld [vmem:[%s3797_s30 + $0x30] sm:$0xf] }
  0x32   : > { %1241 = vrot.lane.b32.xlu1 %v1070_v18, %s3709_s26  ;;  %v573_v40 = vshll.u32 %v3900_v34, 16  ;;  %v1832_v45 = vrot.slane %v3872_v9, 1  ;;  %v571_v48 = vshrl.u32 %v3900_v34, 16  ;;  %v578_v51 = vshll.u32 %v3465_v37, 16  ;;  %v2845_v56 = vld [vmem:[%s3797_s30 + $0x34] sm:$0xf] }
  0x33   : > { %v564_v47 = vor.u32 %v563_v36, %v559_v35  ;;  %v3095_v53 = vcombine.low %v2951_v41, %v3846_v49  ;;  %v1570_v54 = vsel %vm533_vm1, %v1565_v38, %v1569_v39  ;;  %v2842_v57 = vld [vmem:[%s3797_s30 + $0x24] sm:$0xf]  ;;  %v2843_v58 = vld [vmem:[%s3797_s30 + $0x28] sm:$0xf]  ;;  %v3001_v60 = vcombine.low %v256_v46, %v212_v27  ;;  %v2889_v14 = vld [vmem:[%s3797_s30 + $0x30] sm:$0xe] }
  0x34   : > { %1239 = vrot.lane.b32.xlu0 %v1058_v22, %s3709_s26  ;;  %v575_v50 = vrot.slane %v573_v40, 1  ;;  %v1833_v59 = vsel %vm806_vm0, %v1831_v44, %v1832_v45  ;;  %v580_v63 = vrot.slane %v578_v51, 1  ;;  %v3017_v49 = vcombine.low %v2844_v55, %v2845_v56  ;;  %v3928_v5 = vld [vmem:[%s3797_s30 + $0x38] ss:$0 sps:$4 sm:$0x11]  }
  0x35   : > { %v569_v61 = vsel %vm533_vm1, %v564_v47, %v568_v43  ;;  %v1834_v0 = vrot.slane %v3095_v53, 1  ;;  %v1835_v1 = vrot.slane %v3868_v4, 1  ;;  %v3000_v2 = vcombine.low %v255_v52, %v3879_v16  ;;  %v3473_v13 = vld [vmem:[%s3797_s30 + $0x2c] ss:$0 sps:$4 sm:$0x11]  }
  0x36   : > { %1481 = vrot.lane.b32.xlu1 %v3063_v62, %s3710_s27  ;;  %v576_v62 = vor.u32 %v575_v50, %v571_v48  ;;  %v816_v7 = vrot.slane %v3001_v60, 1  ;;  %v817_v8 = vrot.slane %v3465_v37, 1  ;;  %v1086_v9 = vshll.u32 %v3017_v49, 16  ;;  %v2888_v15 = vld [vmem:[%s3797_s30 + $0x24] sm:$0xe] }
  0x37   : > { %v1836_v4 = vsel %vm806_vm0, %v1834_v0, %v1835_v1  ;;  %v813_v10 = vrot.slane %v3000_v2, 1  ;;  %v814_v11 = vrot.slane %v3890_v21, 1  ;;  %v1084_v16 = vshrl.u32 %v3017_v49, 16  ;;  %v2908_v24 = vld [vmem:[%s3797_s30 + $0x3c] sm:$0xf] }
  0x38   : > { %1479 = vrot.lane.b32.xlu0 %v3062_v3, %s3710_s27  ;;  %v3016_v3 = vcombine.low %v2842_v57, %v2843_v58  ;;  %v581_v6 = vsel %vm533_vm1, %v576_v62, %v580_v63  ;;  %v1091_v17 = vshll.u32 %v3928_v5, 16  ;;  %v818_v18 = vsel %vm806_vm0, %v816_v7, %v817_v8  ;;  %v3943_v25 = vld [vmem:[%s3797_s30 + $0x40] sm:$0xf]  ;;  %v2906_v28 = vld [vmem:[%s3797_s30 + $0x30] sm:$0xf] }
  0x39   : > { %v1088_v19 = vrot.slane %v1086_v9, 1  ;;  %v815_v21 = vsel %vm806_vm0, %v813_v10, %v814_v11  ;;  %v1079_v27 = vshll.u32 %v3473_v13, 16  ;;  %v2907_v30 = vld [vmem:[%s3797_s30 + $0x34] sm:$0xf]  ;;  %v3049_v31 = vcombine.low %v2889_v14, %v2845_v56  ;;  %v213_v40 = vld [vmem:[%s3797_s30 + $0x30] sm:$0xf] }
  0x3a   : > { %1753 = vrot.lane.b32.xlu1 %v1582_v42, %s3711_s28  ;;  %v1074_v12 = vshll.u32 %v3016_v3, 16  ;;  %v1072_v22 = vshrl.u32 %v3016_v3, 16  ;;  %v3048_v32 = vcombine.low %v2888_v15, %v2843_v58  ;;  %v3065_v33 = vcombine.low %v2908_v24, %v3943_v25  ;;  %v3953_v41 = vld [vmem:[%s3797_s30 + $0x34] sm:$0xf]  ;;  %v216_v55 = vld [vmem:[%s3797_s30 + $0x40] sm:$0xf] }
  0x3b   : > { %v1089_v35 = vor.u32 %v1088_v19, %v1084_v16  ;;  %v1093_v36 = vrot.slane %v1091_v17, 1  ;;  %v3064_v37 = vcombine.low %v2906_v28, %v2907_v30  ;;  %v1081_v39 = vrot.slane %v1079_v27, 1  ;;  %v3958_v47 = vld [vmem:[%s3797_s30 + $0x44] ss:$0 sps:$4 sm:$0x11]  }
  0x3c   : > { %1751 = vrot.lane.b32.xlu0 %v1570_v54, %s3711_s28  ;;  %v1076_v26 = vrot.slane %v1074_v12, 1  ;;  %v1328_v42 = vrot.slane %v3049_v31, 1  ;;  %v1329_v43 = vrot.slane %v3928_v5, 1  ;;  %v1325_v44 = vrot.slane %v3048_v32, 1  ;;  %v215_v54 = vld [vmem:[%s3797_s30 + $0x3c] sm:$0xf] }
  0x3d   : > { %v1326_v45 = vrot.slane %v3473_v13, 1  ;;  %v1598_v46 = vshll.u32 %v3065_v33, 16  ;;  %v1094_v48 = vsel %vm533_vm1, %v1089_v35, %v1093_v36  ;;  %v1586_v50 = vshll.u32 %v3064_v37, 16  ;;  %v3479_v51 = vld [vmem:[%s3797_s30 + $0x38] ss:$0 sps:$4 sm:$0x11]  }
  0x3e   : > { %730 = vrot.lane.b32.xlu1 %v569_v61, %s3708_s19  ;;  %v1077_v38 = vor.u32 %v1076_v26, %v1072_v22  ;;  %v3964_v52 = vcombine.low %v213_v40, %v3953_v41  ;;  %v1596_v56 = vshrl.u32 %v3065_v33, 16  ;;  %v1603_v58 = vshll.u32 %v3958_v47, 16  ;;  %v2952_v61 = vld [vmem:[%s3797_s30 + $0x30] sm:$0xe]  ;;  %v258_v26 = vld [vmem:[%s3797_s30 + $0x3c] sm:$0xe] }
  0x3f   : > { %v1600_v57 = vrot.slane %v1598_v46, 1  ;;  %v1330_v60 = vsel %vm806_vm0, %v1328_v42, %v1329_v43  ;;  %v3978_v63 = vcombine.low %v215_v54, %v216_v55  ;;  %v1584_v0 = vshrl.u32 %v3064_v37, 16  ;;  %v3483_v10 = vld [vmem:[%s3797_s30 + $0x44] ss:$0 sps:$4 sm:$0x11]  }
  0x40   : > { %1879 = vrot.lane.b32.xlu0 %v1833_v59, %s3712_s29  ;;  %v1082_v53 = vsel %vm533_vm1, %v1077_v38, %v1081_v39  ;;  %v3972_v59 = vld [vmem:[%s3797_s30 + $0x38] ss:$0 sps:$4 sm:$0x11]   ;;  %v585_v62 = vshll.u32 %v3964_v52, 16  ;;  %v1588_v1 = vrot.slane %v1586_v50, 1  ;;  %v1591_v2 = vshll.u32 %v3479_v51, 16 }
  0x41   : > { %v3096_v5 = vcombine.low %v2952_v61, %v2907_v30  ;;  %v1605_v7 = vrot.slane %v1603_v58, 1  ;;  %v590_v8 = vshll.u32 %v3972_v59, 16  ;;  %v583_v9 = vshrl.u32 %v3964_v52, 16  ;;  %v2849_v28 = vld [vmem:[%s3797_s30 + $0x4c] sm:$0xf] }
  0x42   : > { %732 = vrot.lane.b32.xlu1 %v581_v6, %s3708_s19  ;;  %v1601_v6 = vor.u32 %v1600_v57, %v1596_v56  ;;  %v597_v11 = vshll.u32 %v3978_v63, 16  ;;  %v1589_v12 = vor.u32 %v1588_v1, %v1584_v0  ;;  %v1593_v13 = vrot.slane %v1591_v2, 1  ;;  %v257_v30 = vld [vmem:[%s3797_s30 + $0x30] sm:$0xe]  ;;  %v2846_v31 = vld [vmem:[%s3797_s30 + $0x3c] sm:$0xf] }
  0x43   : > { %v592_v16 = vrot.slane %v590_v8, 1  ;;  %v1837_v17 = vrot.slane %v3096_v5, 1  ;;  %v595_v22 = vshrl.u32 %v3978_v63, 16  ;;  %v2847_v32 = vld [vmem:[%s3797_s30 + $0x40] sm:$0xf]  ;;  %v3003_v35 = vcombine.low %v258_v26, %v216_v55 }
  0x44   : > { %1881 = vrot.lane.b32.xlu0 %v1836_v4, %s3712_s29  ;;  %v587_v4 = vrot.slane %v585_v62, 1  ;;  %v1606_v15 = vsel %vm533_vm1, %v1601_v6, %v1605_v7  ;;  %v599_v24 = vrot.slane %v597_v11, 1  ;;  %v1594_v27 = vsel %vm533_vm1, %v1589_v12, %v1593_v13  ;;  %v3491_v55 = vld [vmem:[%s3797_s30 + $0x44] ss:$0 sps:$4 sm:$0x11]  }
  0x45   : > { %v1841_v42 = vrot.slane %v3958_v47, 1  ;;  %v3002_v43 = vcombine.low %v257_v30, %v3953_v41  ;;  %v822_v46 = vrot.slane %v3003_v35, 1  ;;  %v820_v54 = vrot.slane %v3972_v59, 1  ;;  %v2912_v56 = vld [vmem:[%s3797_s30 + $0x54] sm:$0xf] }
  0x46   : > { %861 = vrot.lane.b32.xlu1 %v818_v18, %s3707_s8  ;;  %v1838_v18 = vrot.slane %v3479_v51, 1  ;;  %v588_v19 = vor.u32 %v587_v4, %v583_v9  ;;  %v3490_v51 = vld [vmem:[%s3797_s30 + $0x50] ss:$0 sps:$4 sm:$0x11]   ;;  %v4016_v57 = vld [vmem:[%s3797_s30 + $0x58] sm:$0xf] }
  0x47   : > { %v819_v47 = vrot.slane %v3002_v43, 1  ;;  %v2890_v0 = vld [vmem:[%s3797_s30 + $0x3c] sm:$0xe]  ;;  %v3067_v5 = vcombine.low %v2912_v56, %v4016_v57  ;;  %v2910_v6 = vld [vmem:[%s3797_s30 + $0x48] sm:$0xf] }
  0x48   : > { %859 = vrot.lane.b32.xlu0 %v815_v21, %s3707_s8  ;;  %v602_v21 = vshll.u32 %v3483_v10, 16  ;;  %v593_v36 = vsel %vm533_vm1, %v588_v19, %v592_v16  ;;  %v1839_v40 = vsel %vm806_vm0, %v1837_v17, %v1838_v18  ;;  %v4026_v7 = vld [vmem:[%s3797_s30 + $0x4c] sm:$0xf]  ;;  %v3050_v9 = vcombine.low %v2890_v0, %v2847_v32  ;;  %v217_v11 = vld [vmem:[%s3797_s30 + $0x48] sm:$0xf] }
  0x49   : > { %v821_v59 = vsel %vm806_vm0, %v819_v47, %v820_v54  ;;  %v4032_v12 = vld [vmem:[%s3797_s30 + $0x4c] sm:$0xf]  ;;  %v1622_v16 = vshll.u32 %v3067_v5, 16  ;;  %v1335_v18 = vrot.slane %v3490_v51, 1  ;;  %v219_v30 = vld [vmem:[%s3797_s30 + $0x54] sm:$0xf] }
  0x4a   : > { %973 = vrot.lane.b32.xlu1 %v3017_v49, %s3705_s4  ;;  %v1327_v49 = vsel %vm806_vm0, %v1325_v44, %v1326_v45  ;;  %v604_v38 = vrot.slane %v602_v21, 1  ;;  %v3018_v44 = vcombine.low %v2846_v31, %v2847_v32  ;;  %v4037_v19 = vld [vmem:[%s3797_s30 + $0x5c] ss:$0 sps:$4 sm:$0x11]   ;;  %v1331_v21 = vrot.slane %v3050_v9, 1 }
  0x4b   : > { %v4045_v26 = vld [vmem:[%s3797_s30 + $0x50] ss:$0 sps:$4 sm:$0x11]   ;;  %v4050_v31 = vld [vmem:[%s3797_s30 + $0x58] sm:$0xf]  ;;  %v1620_v32 = vshrl.u32 %v3067_v5, 16 }
  0x4c   : > { %971 = vrot.lane.b32.xlu0 %v3016_v3, %s3705_s4  ;;  %v2953_v3 = vld [vmem:[%s3797_s30 + $0x3c] sm:$0xe]  ;;  %v1098_v41 = vshll.u32 %v3018_v44, 16  ;;  %v1096_v1 = vshrl.u32 %v3018_v44, 16  ;;  %v1627_v35 = vshll.u32 %v4037_v19, 16 }
  0x4d   : > { %v3097_v14 = vcombine.low %v2953_v3, %v3943_v25  ;;  %v2848_v25 = vld [vmem:[%s3797_s30 + $0x48] sm:$0xf]  ;;  %v1103_v3 = vshll.u32 %v3491_v55, 16  ;;  %v3501_v54 = vld [vmem:[%s3797_s30 + $0x5c] ss:$0 sps:$4 sm:$0x11]  }
  0x4e   : > { %1245 = vrot.lane.b32.xlu1 %v1094_v48, %s3709_s26  ;;  %v3019_v39 = vcombine.low %v2848_v25, %v2849_v28  ;;  %v823_v48 = vrot.slane %v3483_v10, 1  ;;  %v1100_v2 = vrot.slane %v1098_v41, 1  ;;  %v1332_v25 = vrot.slane %v3491_v55, 1  ;;  %v2852_v0 = vld [vmem:[%s3797_s30 + $0x60] sm:$0xf] }
  0x4f   : > { %v259_v9 = vld [vmem:[%s3797_s30 + $0x48] sm:$0xe] }
  0x50   : > { %1243 = vrot.lane.b32.xlu0 %v1082_v53, %s3709_s26  ;;  %v1110_v50 = vshll.u32 %v3019_v39, 16  ;;  %v824_v58 = vsel %vm806_vm0, %v822_v46, %v823_v48  ;;  %v1108_v61 = vshrl.u32 %v3019_v39, 16  ;;  %v1101_v13 = vor.u32 %v1100_v2, %v1096_v1  ;;  %v2954_v46 = vld [vmem:[%s3797_s30 + $0x48] sm:$0xe] }
  0x51   : > { %v3098_v55 = vcombine.low %v2954_v46, %v4026_v7  ;;  %v2916_v46 = vld [vmem:[%s3797_s30 + $0x6c] sm:$0xf] }
  0x52   : > { %1373 = vrot.lane.b32.xlu1 %v1330_v60, %s3706_s7  ;;  %v2891_v60 = vld [vmem:[%s3797_s30 + $0x48] sm:$0xe]  ;;  %v1112_v62 = vrot.slane %v1110_v50, 1  ;;  %v1629_v50 = vrot.slane %v1627_v35, 1 }
  0x53   : > { %v3051_v8 = vcombine.low %v2891_v60, %v2849_v28  ;;  %v3532_v60 = vld [vmem:[%s4991_s1 + $0x20] ss:$0 sps:$4 sm:$0xff]  }
  0x54   : > { %1371 = vrot.lane.b32.xlu0 %v1327_v49, %s3706_s7  ;;  %v1115_v49 = vshll.u32 %v3490_v51, 16  ;;  %v1113_v4 = vor.u32 %v1112_v62, %v1108_v61  ;;  %3371 = vmatprep.subr.msk.bf16.mxu0 %vm2244_vm2, %v3532_v60 }
  0x55   : > { %v1334_v17 = vrot.slane %v3051_v8, 1  ;;  %v1844_v8 = vrot.slane %v4045_v26, 1  ;;  %3372 = vmatprep.subr.msk.bf16.mxu1 %vm2244_vm2, %v3532_v60 }
  0x56   : > { %1485 = vrot.lane.b32.xlu1 %v3065_v33, %s3710_s27  ;;  %v1840_v33 = vrot.slane %v3097_v14, 1  ;;  %v1117_v10 = vrot.slane %v1115_v49, 1  ;;  %v1105_v14 = vrot.slane %v1103_v3, 1 }
  0x58   : > { %1483 = vrot.lane.b32.xlu0 %v3064_v37, %s3710_s27  ;;  %v600_v37 = vor.u32 %v599_v24, %v595_v22  ;;  %v1842_v53 = vsel %vm806_vm0, %v1840_v33, %v1841_v42  ;;  %v4040_v22 = vcombine.low %v217_v11, %v4032_v12  ;;  %v1118_v24 = vsel %vm533_vm1, %v1113_v4, %v1117_v10  ;;  %v2850_v4 = vld [vmem:[%s3797_s30 + $0x54] sm:$0xf]  ;;  %v4094_v10 = vld [vmem:[%s3797_s30 + $0x58] sm:$0xf] }
  0x59   : > { %v1624_v33 = vrot.slane %v1622_v16, 1  ;;  %v2246_v11 = vsel %vm2244_vm2, %v3532_v60, 0 }
  0x5a   : > { %1757 = vrot.lane.b32.xlu1 %v1606_v15, %s3711_s28  ;;  %v605_v45 = vsel %vm533_vm1, %v600_v37, %v604_v38  ;;  %v3066_v15 = vcombine.low %v2910_v6, %v4026_v7  ;;  %v609_v37 = vshll.u32 %v4040_v22, 16  ;;  %v1336_v38 = vsel %vm806_vm0, %v1334_v17, %v1335_v18  ;;  %v4085_v7 = vld [vmem:[%s3797_s30 + $0x64] sm:$0xf]  ;;  %3328 = vmatpush3.bf16.msra.mxu0 %v2246_v11 }
  0x5b   : > { %v1625_v48 = vor.u32 %v1624_v33, %v1620_v32  ;;  %v607_v51 = vshrl.u32 %v4040_v22, 16  ;;  %v626_v6 = vshll.u32 %v3501_v54, 16  ;;  %3370 = vmatpush3.bf16.msra.mxu1 %v2246_v11  ;;  %v3508_v32 = vld [vmem:[%s3797_s30 + $0x68] ss:$0 sps:$4 sm:$0x11]  }
  0x5c   : > { %1755 = vrot.lane.b32.xlu0 %v1594_v27, %s3711_s28  ;;  %v1106_v27 = vsel %vm533_vm1, %v1101_v13, %v1105_v14  ;;  %v1610_v28 = vshll.u32 %v3066_v15, 16  ;;  %v1608_v42 = vshrl.u32 %v3066_v15, 16  ;;  %v3021_v14 = vcombine.low %v2852_v0, %v4085_v7  ;;  %v3509_v33 = vld [vmem:[%s3797_s30 + $0x5c] ss:$0 sps:$4 sm:$0x11]  }
  0x5d   : > { %v1630_v62 = vsel %vm533_vm1, %v1625_v48, %v1629_v50  ;;  %v628_v17 = vrot.slane %v626_v6, 1  ;;  %v4119_v48 = vld [vmem:[%s3797_s30 + $0x70] sm:$0xf]  ;;  %v4132_v0 = vld [vmem:[%s3797_s30 + $0x64] sm:$0xf] }
  0x5e   : > { %734 = vrot.lane.b32.xlu1 %v593_v36, %s3708_s19  ;;  %v4055_v36 = vld [vmem:[%s3797_s30 + $0x50] ss:$0 sps:$4 sm:$0x11]   ;;  %v1612_v43 = vrot.slane %v1610_v28, 1  ;;  %v829_v28 = vrot.slane %v3501_v54, 1 }
  0x5f   : > { %v614_v47 = vshll.u32 %v4055_v36, 16  ;;  %v2915_v54 = vld [vmem:[%s3797_s30 + $0x64] sm:$0xf]  ;;  %v223_v11 = vld [vmem:[%s3797_s30 + $0x6c] sm:$0xf] }
  0x60   : > { %1883 = vrot.lane.b32.xlu0 %v1839_v40, %s3712_s29  ;;  %v1333_v40 = vsel %vm806_vm0, %v1331_v21, %v1332_v25  ;;  %v1613_v56 = vor.u32 %v1612_v43, %v1608_v42  ;;  %v1847_v21 = vrot.slane %v4037_v19, 1 }
  0x61   : > { %v616_v49 = vrot.slane %v614_v47, 1  ;;  %v2914_v47 = vld [vmem:[%s3797_s30 + $0x60] sm:$0xf] }
  0x62   : > { %736 = vrot.lane.b32.xlu1 %v605_v45, %s3708_s19  ;;  %v2955_v45 = vld [vmem:[%s3797_s30 + $0x54] sm:$0xe] }
  0x63   : > { %v3099_v61 = vcombine.low %v2955_v45, %v4016_v57  ;;  %v1127_v45 = vshll.u32 %v3509_v33, 16 }
  0x64   : > { %1885 = vrot.lane.b32.xlu0 %v1842_v53, %s3712_s29  ;;  %v611_v53 = vrot.slane %v609_v37, 1 }
  0x65   : > { %v1846_v18 = vrot.slane %v3099_v61, 1  ;;  %v1129_v61 = vrot.slane %v1127_v45, 1  ;;  %v2957_v45 = vld [vmem:[%s3797_s30 + $0x6c] sm:$0xe] }
  0x66   : > { %865 = vrot.lane.b32.xlu1 %v824_v58, %s3707_s8  ;;  %v612_v1 = vor.u32 %v611_v53, %v607_v51 }
  0x67   : > { %v1848_v19 = vsel %vm806_vm0, %v1846_v18, %v1847_v21 }
  0x68   : > { %863 = vrot.lane.b32.xlu0 %v821_v59, %s3707_s8  ;;  %v260_v59 = vld [vmem:[%s3797_s30 + $0x54] sm:$0xe] }
  0x69   : > { %v3005_v13 = vcombine.low %v260_v59, %v4050_v31  ;;  %v221_v59 = vld [vmem:[%s3797_s30 + $0x60] sm:$0xf] }
  0x6a   : > { %977 = vrot.lane.b32.xlu1 %v3019_v39, %s3705_s4  ;;  %v4061_v39 = vcombine.low %v219_v30, %v4050_v31  ;;  %v1134_v30 = vshll.u32 %v3021_v14, 16 }
  0x6b   : > { %v828_v25 = vrot.slane %v3005_v13, 1  ;;  %v4149_v13 = vld [vmem:[%s3797_s30 + $0x70] sm:$0xf] }
  0x6c   : > { %975 = vrot.lane.b32.xlu0 %v3018_v44, %s3705_s4  ;;  %v1615_v44 = vshll.u32 %v4045_v26, 16  ;;  %v621_v41 = vshll.u32 %v4061_v39, 16  ;;  %v619_v2 = vshrl.u32 %v4061_v39, 16  ;;  %v3004_v26 = vcombine.low %v259_v9, %v4032_v12 }
  0x6d   : > { %v826_v12 = vrot.slane %v4055_v36, 1  ;;  %v1136_v42 = vrot.slane %v1134_v30, 1  ;;  %v830_v43 = vsel %vm806_vm0, %v828_v25, %v829_v28  ;;  %v2892_v36 = vld [vmem:[%s3797_s30 + $0x54] sm:$0xe] }
  0x6e   : > { %1249 = vrot.lane.b32.xlu1 %v1118_v24, %s3709_s26  ;;  %v1617_v58 = vrot.slane %v1615_v44, 1  ;;  %v623_v3 = vrot.slane %v621_v41, 1  ;;  %v825_v35 = vrot.slane %v3004_v26, 1  ;;  %v1139_v44 = vshll.u32 %v3508_v32, 16 }
  0x6f   : > { %v4161_v26 = vcombine.low %v223_v11, %v4149_v13 }
  0x70   : > { %1247 = vrot.lane.b32.xlu0 %v1106_v27, %s3709_s26  ;;  %v1618_v57 = vsel %vm533_vm1, %v1613_v56, %v1617_v58  ;;  %v624_v16 = vor.u32 %v623_v3, %v619_v2  ;;  %v3020_v27 = vcombine.low %v2850_v4, %v4094_v10  ;;  %v827_v50 = vsel %vm806_vm0, %v825_v35, %v826_v12  ;;  %v4136_v3 = vld [vmem:[%s3797_s30 + $0x74] ss:$0 sps:$4 sm:$0x11]  }
  0x71   : > { %v3052_v56 = vcombine.low %v2892_v36, %v4094_v10  ;;  %v1141_v60 = vrot.slane %v1139_v44, 1  ;;  %v1338_v4 = vrot.slane %v3509_v33, 1  ;;  %v4171_v12 = vld [vmem:[%s3797_s30 + $0x74] ss:$0 sps:$4 sm:$0x11]  }
  0x72   : > { %1377 = vrot.lane.b32.xlu1 %v1336_v38, %s3706_s7  ;;  %v629_v31 = vsel %vm533_vm1, %v624_v16, %v628_v17  ;;  %v1122_v37 = vshll.u32 %v3020_v27, 16  ;;  %v2893_v38 = vld [vmem:[%s3797_s30 + $0x60] sm:$0xe]  ;;  %v1120_v51 = vshrl.u32 %v3020_v27, 16  ;;  %v1651_v17 = vshll.u32 %v4136_v3, 16 }
  0x73   : > { %v3053_v41 = vcombine.low %v2893_v38, %v4085_v7  ;;  %v1341_v7 = vrot.slane %v3508_v32, 1 }
  0x74   : > { %1375 = vrot.lane.b32.xlu0 %v1333_v40, %s3706_s7  ;;  %v1132_v40 = vshrl.u32 %v3021_v14, 16  ;;  %v1124_v53 = vrot.slane %v1122_v37, 1  ;;  %v1653_v35 = vrot.slane %v1651_v17, 1  ;;  %v4219_v17 = vld [vmem:[%s3797_s30 + $0x80] ss:$0 sps:$4 sm:$0x11]  }
  0x76   : > { %1489 = vrot.lane.b32.xlu1 %v3067_v5, %s3710_s27  ;;  %v1843_v5 = vrot.slane %v3098_v55, 1  ;;  %v3069_v55 = vcombine.low %v2916_v46, %v4119_v48  ;;  %v1137_v58 = vor.u32 %v1136_v42, %v1132_v40  ;;  %v645_v42 = vshll.u32 %v4161_v26, 16 }
  0x78   : > { %1487 = vrot.lane.b32.xlu0 %v3066_v15, %s3710_s27  ;;  %v617_v15 = vsel %vm533_vm1, %v612_v1, %v616_v49  ;;  %v1845_v24 = vsel %vm806_vm0, %v1843_v5, %v1844_v8  ;;  %v3068_v49 = vcombine.low %v2914_v47, %v2915_v54  ;;  %v1340_v1 = vrot.slane %v3053_v41, 1  ;;  %v4141_v5 = vld [vmem:[%s3797_s30 + $0x68] ss:$0 sps:$4 sm:$0x11]  }
  0x79   : > { %v1646_v2 = vshll.u32 %v3069_v55, 16  ;;  %v1142_v6 = vsel %vm533_vm1, %v1137_v58, %v1141_v60  ;;  %v4144_v8 = vcombine.low %v221_v59, %v4132_v0  ;;  %v1639_v30 = vshll.u32 %v4141_v5, 16  ;;  %v261_v58 = vld [vmem:[%s3797_s30 + $0x60] sm:$0xe]  ;;  %v2856_v59 = vld [vmem:[%s3797_s30 + $0x78] sm:$0xf] }
  0x7a   : > { %1761 = vrot.lane.b32.xlu1 %v1630_v62, %s3711_s28  ;;  %v1125_v62 = vor.u32 %v1124_v53, %v1120_v51  ;;  %v1634_v10 = vshll.u32 %v3068_v49, 16  ;;  %v1342_v18 = vsel %vm806_vm0, %v1340_v1, %v1341_v7  ;;  %v1632_v25 = vshrl.u32 %v3068_v49, 16  ;;  %v262_v53 = vld [vmem:[%s3797_s30 + $0x6c] sm:$0xe]  ;;  %v4194_v1 = vld [vmem:[%s3797_s30 + $0x7c] sm:$0xf] }
  0x7b   : > { %v1648_v16 = vrot.slane %v1646_v2, 1  ;;  %v633_v21 = vshll.u32 %v4144_v8, 16  ;;  %v631_v37 = vshrl.u32 %v4144_v8, 16  ;;  %v1641_v44 = vrot.slane %v1639_v30, 1  ;;  %v2854_v2 = vld [vmem:[%s3797_s30 + $0x6c] sm:$0xf] }
  0x7c   : > { %1759 = vrot.lane.b32.xlu0 %v1618_v57, %s3711_s28  ;;  %v1337_v57 = vrot.slane %v3052_v56, 1  ;;  %v1130_v9 = vsel %vm533_vm1, %v1125_v62, %v1129_v61  ;;  %v1636_v28 = vrot.slane %v1634_v10, 1  ;;  %v1850_v36 = vrot.slane %v4141_v5, 1 }
  0x7d   : > { %v635_v38 = vrot.slane %v633_v21, 1  ;;  %v650_v51 = vshll.u32 %v4171_v12, 16  ;;  %v647_v56 = vrot.slane %v645_v42, 1  ;;  %v3101_v60 = vcombine.low %v2957_v45, %v4119_v48 }
  0x7e   : > { %738 = vrot.lane.b32.xlu1 %v617_v15, %s3708_s19  ;;  %v1644_v15 = vshrl.u32 %v3069_v55, 16  ;;  %v3007_v7 = vcombine.low %v262_v53, %v4149_v13  ;;  %v3006_v5 = vcombine.low %v261_v58, %v4132_v0  ;;  %v835_v0 = vrot.slane %v4171_v12, 1  ;;  %v4249_v53 = vld [vmem:[%s3797_s30 + $0x7c] sm:$0xf] }
  0x7f   : > { %v1852_v11 = vrot.slane %v3101_v60, 1 }
  0x80   : > { %1887 = vrot.lane.b32.xlu0 %v1845_v24, %s3712_s29  ;;  %v4157_v24 = vld [vmem:[%s3797_s30 + $0x68] ss:$0 sps:$4 sm:$0x11]   ;;  %v834_v21 = vrot.slane %v3007_v7, 1  ;;  %v225_v7 = vld [vmem:[%s3797_s30 + $0x78] sm:$0xf] }
  0x81   : > { %v638_v40 = vshll.u32 %v4157_v24, 16 }
  0x82   : > { %740 = vrot.lane.b32.xlu1 %v629_v31, %s3708_s19 }
  0x83   : > { %v640_v41 = vrot.slane %v638_v40, 1 }
  0x84   : > { %1889 = vrot.lane.b32.xlu0 %v1848_v19, %s3712_s29  ;;  %v1649_v19 = vor.u32 %v1648_v16, %v1644_v15  ;;  %v832_v16 = vrot.slane %v4157_v24, 1  ;;  %v4229_v24 = vld [vmem:[%s3797_s30 + $0x74] ss:$0 sps:$4 sm:$0x11]  }
  0x86   : > { %869 = vrot.lane.b32.xlu1 %v830_v43, %s3707_s8  ;;  %v1637_v43 = vor.u32 %v1636_v28, %v1632_v25  ;;  %v1654_v46 = vsel %vm533_vm1, %v1649_v19, %v1653_v35  ;;  %v2895_v19 = vld [vmem:[%s3797_s30 + $0x78] sm:$0xe]  ;;  %v2894_v35 = vld [vmem:[%s3797_s30 + $0x6c] sm:$0xe] }
  0x88   : > { %867 = vrot.lane.b32.xlu0 %v827_v50, %s3707_s8  ;;  %v1642_v62 = vsel %vm533_vm1, %v1637_v43, %v1641_v44  ;;  %v2920_v43 = vld [vmem:[%s3797_s30 + $0x84] sm:$0xf]  ;;  %v4241_v44 = vld [vmem:[%s3797_s30 + $0x88] sm:$0xf] }
  0x89   : > { %v4257_v58 = vcombine.low %v2920_v43, %v4241_v44 }
  0x8a   : > { %981 = vrot.lane.b32.xlu1 %v3021_v14, %s3705_s4  ;;  %v2956_v14 = vld [vmem:[%s3797_s30 + $0x60] sm:$0xe] }
  0x8b   : > { %v3100_v33 = vcombine.low %v2956_v14, %v2915_v54  ;;  %v636_v54 = vor.u32 %v635_v38, %v631_v37  ;;  %v1853_v14 = vrot.slane %v4136_v3, 1  ;;  %v831_v3 = vrot.slane %v3006_v5, 1 }
  0x8c   : > { %979 = vrot.lane.b32.xlu0 %v3020_v27, %s3705_s4  ;;  %v1339_v27 = vsel %vm806_vm0, %v1337_v57, %v1338_v4  ;;  %v1163_v37 = vshll.u32 %v4219_v17, 16  ;;  %v836_v38 = vsel %vm806_vm0, %v834_v21, %v835_v0  ;;  %v1347_v5 = vrot.slane %v4219_v17, 1 }
  0x8d   : > { %v1849_v50 = vrot.slane %v3100_v33, 1  ;;  %v641_v48 = vsel %vm533_vm1, %v636_v54, %v640_v41  ;;  %v1854_v28 = vsel %vm806_vm0, %v1852_v11, %v1853_v14  ;;  %v1344_v11 = vrot.slane %v4229_v24, 1 }
  0x8e   : > { %1253 = vrot.lane.b32.xlu1 %v1142_v6, %s3709_s26  ;;  %v4198_v6 = vld [vmem:[%s3797_s30 + $0x70] sm:$0xf]  ;;  %v1670_v14 = vshll.u32 %v4257_v58, 16 }
  0x8f   : > { %v1851_v10 = vsel %vm806_vm0, %v1849_v50, %v1850_v36  ;;  %v4213_v13 = vcombine.low %v2854_v2, %v4198_v6  ;;  %v1151_v36 = vshll.u32 %v4229_v24, 16 }
  0x90   : > { %1251 = vrot.lane.b32.xlu0 %v1130_v9, %s3709_s26  ;;  %v4206_v9 = vcombine.low %v2856_v59, %v4194_v1 }
  0x91   : > { %v1146_v30 = vshll.u32 %v4213_v13, 16  ;;  %v1144_v42 = vshrl.u32 %v4213_v13, 16 }
  0x92   : > { %1381 = vrot.lane.b32.xlu1 %v1342_v18, %s3706_s7  ;;  %v4166_v31 = vpop.permute.xlu1 %969  ;;  %v1156_v12 = vshrl.u32 %v4206_v9, 16 }
  0x93   : > { %v4168_v32 = vpop.permute.xlu0 %967  ;;  %v1148_v50 = vrot.slane %v1146_v30, 1 }
  0x94   : > { %1379 = vrot.lane.b32.xlu0 %v1339_v27, %s3706_s7  ;;  %v1158_v27 = vshll.u32 %v4206_v9, 16 }
  0x96   : > { %1493 = vrot.lane.b32.xlu1 %v3069_v55, %s3710_s27  ;;  %v643_v55 = vshrl.u32 %v4161_v26, 16  ;;  %v1160_v40 = vrot.slane %v1158_v27, 1  ;;  %v227_v27 = vld [vmem:[%s3797_s30 + $0x84] sm:$0xf] }
  0x97   : > { %v4184_v47 = vpop.permute.xlu0 %1367 }
  0x98   : > { %1491 = vrot.lane.b32.xlu0 %v3068_v49, %s3710_s27  ;;  %v4189_v61 = vpop.permute.xlu1 %855  ;;  %v652_v49 = vrot.slane %v650_v51, 1  ;;  %v648_v57 = vor.u32 %v647_v56, %v643_v55  ;;  %v2918_v51 = vld [vmem:[%s3797_s30 + $0x78] sm:$0xf]  ;;  %v3055_v55 = vcombine.low %v2895_v19, %v4194_v1  ;;  %v3054_v56 = vcombine.low %v2894_v35, %v4198_v6 }
  0x99   : > { %v4263_v59 = vcombine.low %v2918_v51, %v4249_v53  ;;  %v1149_v6 = vor.u32 %v1148_v50, %v1144_v42  ;;  %v1672_v19 = vrot.slane %v1670_v14, 1 }
  0x9a   : > { %1765 = vrot.lane.b32.xlu1 %v1654_v46, %s3711_s28  ;;  %v653_v18 = vsel %vm533_vm1, %v648_v57, %v652_v49  ;;  %v833_v46 = vsel %vm806_vm0, %v831_v3, %v832_v16  ;;  %v1153_v49 = vrot.slane %v1151_v36, 1  ;;  %v1346_v57 = vrot.slane %v3055_v55, 1  ;;  %v2959_v55 = vld [vmem:[%s3797_s30 + $0x84] sm:$0xe] }
  0x9b   : > { %v1658_v17 = vshll.u32 %v4263_v59, 16  ;;  %v3103_v14 = vcombine.low %v2959_v55, %v4241_v44  ;;  %v3549_v55 = vld [vmem:[%s3797_s30 + $0x98] ss:$0 sps:$4 sm:$0x11]  }
  0x9c   : > { %1763 = vrot.lane.b32.xlu0 %v1642_v62, %s3711_s28  ;;  %v4208_v4 = vpop.permute.xlu1 %857  ;;  %v1165_v62 = vrot.slane %v1163_v37, 1  ;;  %v1154_v3 = vsel %vm533_vm1, %v1149_v6, %v1153_v49  ;;  %v1348_v30 = vsel %vm806_vm0, %v1346_v57, %v1347_v5  ;;  %v1656_v37 = vshrl.u32 %v4263_v59, 16  ;;  %v4337_v6 = vld [vmem:[%s3797_s30 + $0x8c] ss:$0 sps:$4 sm:$0x11]  }
  0x9d   : > { %v1660_v50 = vrot.slane %v1658_v17, 1  ;;  %v674_v44 = vshll.u32 %v4337_v6, 16 }
  0x9e   : > { %v727_v15 = vpop.permute.xlu0 %726  ;;  %742 = vrot.lane.b32.xlu1 %v641_v48, %s3708_s19  ;;  %v4271_v48 = vld [vmem:[%s3797_s30 + $0x7c] sm:$0xf] }
  0x9f   : > { %v1913_v54 = vsel %vm1911_vm3, %v3825_v23, %v727_v15  ;;  %v1161_v23 = vor.u32 %v1160_v40, %v1156_v12  ;;  %v4281_v15 = vld [vmem:[%s3797_s30 + $0x8c] ss:$0 sps:$4 sm:$0x11]   ;;  %v4309_v12 = vld [vmem:[%s3797_s30 + $0x80] ss:$0 sps:$4 sm:$0x11]  }
  0xa0   : > { %1891 = vrot.lane.b32.xlu0 %v1851_v10, %s3712_s29  ;;  %v4224_v25 = vpop.permute.xlu1 %1369  ;;  %v1946_v1 = vsel %vm1944_vm4, %v1913_v54, %v4189_v61  ;;  %v1343_v10 = vrot.slane %v3054_v56, 1  ;;  %v1675_v35 = vshll.u32 %v4281_v15, 16  ;;  %v2958_v54 = vld [vmem:[%s3797_s30 + $0x78] sm:$0xe] }
  0xa1   : > { %v1979_v0 = vsel %vm1977_vm5, %v1946_v1, %v4168_v32  ;;  %v1166_v16 = vsel %vm533_vm1, %v1161_v23, %v1165_v62  ;;  %v4299_v32 = vld [vmem:[%s3797_s30 + $0x88] sm:$0xf]  ;;  %v3102_v57 = vcombine.low %v2958_v54, %v4249_v53 }
  0xa2   : > { %v729_v33 = vpop.permute.xlu0 %728  ;;  %744 = vrot.lane.b32.xlu1 %v653_v18, %s3708_s19  ;;  %v4290_v18 = vld [vmem:[%s3797_s30 + $0x80] ss:$0 sps:$4 sm:$0x11]   ;;  %v1345_v24 = vsel %vm806_vm0, %v1343_v10, %v1344_v11  ;;  %v4317_v40 = vcombine.low %v227_v27, %v4299_v32 }
  0xa3   : > { %v1915_v60 = vsel %vm1911_vm3, %v3830_v29, %v729_v33  ;;  %v1668_v33 = vshrl.u32 %v4257_v58, 16  ;;  %v1856_v27 = vrot.slane %v4290_v18, 1 }
  0xa4   : > { %1893 = vrot.lane.b32.xlu0 %v1854_v28, %s3712_s29  ;;  %v4243_v45 = vpop.permute.xlu1 %1241  ;;  %v1948_v61 = vsel %vm1944_vm4, %v1915_v60, %v4208_v4  ;;  %v4293_v4 = vcombine.low %v225_v7, %v4271_v48  ;;  %v1677_v60 = vrot.slane %v1675_v35, 1  ;;  %v669_v49 = vshll.u32 %v4317_v40, 16 }
  0xa5   : > { %v1673_v56 = vor.u32 %v1672_v19, %v1668_v33  ;;  %v4370_v33 = vld [vmem:[%s3797_s30 + $0x88] sm:$0xf]  ;;  %v1858_v19 = vrot.slane %v3103_v14, 1 }
  0xa6   : > { %v1240_v41 = vpop.permute.xlu0 %1239  ;;  %873 = vrot.lane.b32.xlu1 %v836_v38, %s3707_s8  ;;  %v657_v38 = vshll.u32 %v4293_v4, 16  ;;  %v655_v62 = vshrl.u32 %v4293_v4, 16  ;;  %v671_v17 = vrot.slane %v669_v49, 1  ;;  %v2897_v49 = vld [vmem:[%s3797_s30 + $0x90] sm:$0xe] }
  0xa8   : > { %871 = vrot.lane.b32.xlu0 %v833_v46, %s3707_s8  ;;  %v4267_v2 = vpop.permute.xlu1 %1481  ;;  %v659_v1 = vrot.slane %v657_v38, 1 }
  0xaa   : > { %v1480_v29 = vpop.permute.xlu0 %1479  ;;  %985 = vrot.lane.b32.xlu1 %v4206_v9, %s3705_s4  ;;  %v2012_v9 = vsel %vm2010_vm6, %v1979_v0, %v1240_v41  ;;  %v660_v53 = vor.u32 %v659_v1, %v655_v62  ;;  %v3550_v62 = vld [vmem:[%s3797_s30 + $0x8c] ss:$0 sps:$4 sm:$0x11]  }
  0xac   : > { %983 = vrot.lane.b32.xlu0 %v4213_v13, %s3705_s4  ;;  %v1754_v21 = vpop.permute.xlu1 %1753  ;;  %v1981_v13 = vsel %vm1977_vm5, %v1948_v61, %v4166_v31  ;;  %v2045_v31 = vsel %vm2043_vm7, %v2012_v9, %v4184_v47  ;;  %v1663_v47 = vshll.u32 %v4290_v18, 16  ;;  %v264_v9 = vld [vmem:[%s3797_s30 + $0x84] sm:$0xe] }
  0xad   : > { %v2014_v42 = vsel %vm2010_vm6, %v1981_v13, %v4243_v45  ;;  %v2078_v43 = vsel %vm2076_vm8, %v2045_v31, %v1480_v29  ;;  %v662_v45 = vshll.u32 %v4309_v12, 16  ;;  %v2860_v13 = vld [vmem:[%s3797_s30 + $0x90] sm:$0xf]  ;;  %v3009_v35 = vcombine.low %v264_v9, %v4299_v32  ;;  %v4413_v9 = vld [vmem:[%s3797_s30 + $0x94] sm:$0xf] }
  0xae   : > { %v1752_v28 = vpop.permute.xlu0 %1751  ;;  %1257 = vrot.lane.b32.xlu1 %v1166_v16, %s3709_s26  ;;  %v2047_v23 = vsel %vm2043_vm7, %v2014_v42, %v4224_v25  ;;  %v1661_v25 = vor.u32 %v1660_v50, %v1656_v37  ;;  %v1665_v5 = vrot.slane %v1663_v47, 1  ;;  %v667_v16 = vshrl.u32 %v4317_v40, 16 }
  0xaf   : > { %v2111_v36 = vsel %vm2109_vm9, %v2078_v43, %v1752_v28  ;;  %v2080_v7 = vsel %vm2076_vm8, %v2047_v23, %v4267_v2  ;;  %v1678_v2 = vsel %vm533_vm1, %v1673_v56, %v1677_v60  ;;  %v664_v0 = vrot.slane %v662_v45, 1  ;;  %v4363_v28 = vld [vmem:[%s3797_s30 + $0x94] sm:$0xf] }
  0xb0   : > { %1255 = vrot.lane.b32.xlu0 %v1154_v3, %s3709_s26  ;;  %v4322_v46 = vpop.permute.xlu1 %730  ;;  %v2113_v10 = vsel %vm2109_vm9, %v2080_v7, %v1754_v21  ;;  %v1855_v3 = vrot.slane %v3102_v57, 1  ;;  %v672_v18 = vor.u32 %v671_v17, %v667_v16  ;;  %v676_v37 = vrot.slane %v674_v44, 1  ;;  %v2924_v7 = vld [vmem:[%s3797_s30 + $0x9c] sm:$0xf]  ;;  %v4399_v57 = vld [vmem:[%s3797_s30 + $0xa0] sm:$0xf] }
  0xb1   : > { %v665_v31 = vsel %vm533_vm1, %v660_v53, %v664_v0  ;;  %v3025_v38 = vcombine.low %v2860_v13, %v4363_v28  ;;  %v1859_v50 = vrot.slane %v4281_v15, 1  ;;  %v840_v54 = vrot.slane %v3009_v35, 1  ;;  %v2922_v44 = vld [vmem:[%s3797_s30 + $0x90] sm:$0xf]  ;;  %v4425_v35 = vld [vmem:[%s3797_s30 + $0x94] sm:$0xf] }
  0xb2   : > { %v1880_v51 = vpop.permute.xlu0 %1879  ;;  %1385 = vrot.lane.b32.xlu1 %v1348_v30, %s3706_s7  ;;  %v263_v30 = vld [vmem:[%s3797_s30 + $0x78] sm:$0xe]  ;;  %v1857_v43 = vsel %vm806_vm0, %v1855_v3, %v1856_v27  ;;  %v838_v45 = vrot.slane %v4309_v12, 1  ;;  %v1175_v0 = vshll.u32 %v3550_v62, 16  ;;  %v3057_v16 = vcombine.low %v2897_v49, %v4363_v28 }
  0xb3   : > { %v2144_v41 = vsel %vm2142_vm10, %v2111_v36, %v1880_v51  ;;  %v3008_v47 = vcombine.low %v263_v30, %v4271_v48  ;;  %v677_v51 = vsel %vm533_vm1, %v672_v18, %v676_v37  ;;  %v1182_v15 = vshll.u32 %v3025_v38, 16 }
  0xb4   : > { %1383 = vrot.lane.b32.xlu0 %v1345_v24, %s3706_s7  ;;  %3329 = vmatprep.mubr.msk.bf16.mxu0 %vm2211_vm11, %v2144_v41  ;;  %v4342_v29 = vpop.permute.xlu1 %732  ;;  %v2858_v24 = vld [vmem:[%s3797_s30 + $0x84] sm:$0xf]  ;;  %v841_v41 = vrot.slane %v4337_v6, 1  ;;  %v1860_v56 = vsel %vm806_vm0, %v1858_v19, %v1859_v50  ;;  %v4409_v17 = vcombine.low %v2924_v7, %v4399_v57  ;;  %v1177_v28 = vrot.slane %v1175_v0, 1  ;;  %v229_v19 = vld [vmem:[%s3797_s30 + $0x90] sm:$0xf] }
  0xb5   : > { %v3024_v32 = vcombine.low %v2858_v24, %v4370_v33  ;;  %v837_v60 = vrot.slane %v3008_v47, 1  ;;  %v4421_v24 = vcombine.low %v2922_v44, %v4413_v9  ;;  %v1352_v18 = vrot.slane %v3057_v16, 1  ;;  %v4430_v47 = vld [vmem:[%s3797_s30 + $0xa4] ss:$0 sps:$4 sm:$0x11]  }
  0xb6   : > { %v1882_v11 = vpop.permute.xlu0 %1881  ;;  %1497 = vrot.lane.b32.xlu1 %v4257_v58, %s3710_s27  ;;  %v1666_v58 = vsel %vm533_vm1, %v1661_v25, %v1665_v5  ;;  %v842_v6 = vsel %vm806_vm0, %v840_v54, %v841_v41  ;;  %v2896_v25 = vld [vmem:[%s3797_s30 + $0x84] sm:$0xe]  ;;  %v1180_v5 = vshrl.u32 %v3025_v38, 16  ;;  %v1694_v37 = vshll.u32 %v4409_v17, 16  ;;  %v2960_v44 = vld [vmem:[%s3797_s30 + $0x90] sm:$0xe] }
  0xb7   : > { %v2146_v61 = vsel %vm2142_vm10, %v2113_v10, %v1882_v11  ;;  %v1170_v23 = vshll.u32 %v3024_v32, 16  ;;  %v1184_v10 = vrot.slane %v1182_v15, 1  ;;  %v1187_v11 = vshll.u32 %v3549_v55, 16  ;;  %v4438_v41 = vld [vmem:[%s3797_s30 + $0x98] ss:$0 sps:$4 sm:$0x11]  }
  0xb8   : > { %1495 = vrot.lane.b32.xlu0 %v4263_v59, %s3710_s27  ;;  %3330 = vmatmul.mubr.msk.bf16.vlgmr.msra.gmra.mrb[0].mxu0 %vm2211_vm11, %v2146_v61  ;;  %v4357_v21 = vpop.permute.xlu1 %861  ;;  %v839_v61 = vsel %vm806_vm0, %v837_v60, %v838_v45  ;;  %v1168_v14 = vshrl.u32 %v3024_v32, 16  ;;  %v1350_v50 = vrot.slane %v3550_v62, 1  ;;  %v4441_v15 = vcombine.low %v229_v19, %v4425_v35  ;;  %v231_v45 = vld [vmem:[%s3797_s30 + $0x9c] sm:$0xf] }
  0xb9   : > { %v1185_v3 = vor.u32 %v1184_v10, %v1180_v5  ;;  %v1189_v27 = vrot.slane %v1187_v11, 1  ;;  %v1682_v60 = vshll.u32 %v4421_v24, 16  ;;  %v1692_v62 = vshrl.u32 %v4409_v17, 16  ;;  %v4461_v5 = vld [vmem:[%s3797_s30 + $0x98] ss:$0 sps:$4 sm:$0x11]  }
  0xba   : > { %v4365_v59 = vpop.permute.xlu0 %859  ;;  %1769 = vrot.lane.b32.xlu1 %v1678_v2, %s3711_s28  ;;  %v1172_v2 = vrot.slane %v1170_v23, 1  ;;  %v1696_v49 = vrot.slane %v1694_v37, 1  ;;  %v679_v19 = vshrl.u32 %v4441_v15, 16 }
  0xbb   : > { %v1190_v54 = vsel %vm533_vm1, %v1185_v3, %v1189_v27  ;;  %v1684_v0 = vrot.slane %v1682_v60, 1  ;;  %v2961_v27 = vld [vmem:[%s3797_s30 + $0x9c] sm:$0xe] }
  0xbc   : > { %1767 = vrot.lane.b32.xlu0 %v1666_v58, %s3711_s28  ;;  %v4377_v42 = vpop.permute.xlu1 %973  ;;  %v3056_v58 = vcombine.low %v2896_v25, %v4370_v33  ;;  %v1173_v30 = vor.u32 %v1172_v2, %v1168_v14  ;;  %v1353_v33 = vrot.slane %v3549_v55, 1  ;;  %v1680_v25 = vshrl.u32 %v4421_v24, 16 }
  0xbe   : > { %v4383_v36 = vpop.permute.xlu0 %971  ;;  %746 = vrot.lane.b32.xlu1 %v665_v31, %s3708_s19  ;;  %v1354_v23 = vsel %vm806_vm0, %v1352_v18, %v1353_v33  ;;  %v4494_v18 = vld [vmem:[%s3797_s30 + $0xa4] ss:$0 sps:$4 sm:$0x11]  }
  0xc0   : > { %1895 = vrot.lane.b32.xlu0 %v1857_v43, %s3712_s29  ;;  %v4390_v48 = vpop.permute.xlu1 %1245  ;;  %v1349_v43 = vrot.slane %v3056_v58, 1  ;;  %v1697_v58 = vor.u32 %v1696_v49, %v1692_v62  ;;  %v1862_v62 = vrot.slane %v4438_v41, 1  ;;  %v2864_v49 = vld [vmem:[%s3797_s30 + $0xa8] sm:$0xf] }
  0xc2   : > { %v1244_v1 = vpop.permute.xlu0 %1243  ;;  %748 = vrot.lane.b32.xlu1 %v677_v51, %s3708_s19  ;;  %v1917_v51 = vsel %vm1911_vm3, %v3887_v20, %v4322_v46  ;;  %v4449_v20 = vld [vmem:[%s3797_s30 + $0xa0] sm:$0xf]  ;;  %v1351_v7 = vsel %vm806_vm0, %v1349_v43, %v1350_v50  ;;  %v3104_v43 = vcombine.low %v2960_v44, %v4413_v9 }
  0xc3   : > { %v4470_v11 = vcombine.low %v231_v45, %v4449_v20 }
  0xc4   : > { %1897 = vrot.lane.b32.xlu0 %v1860_v56, %s3712_s29  ;;  %v4404_v12 = vpop.permute.xlu1 %1373  ;;  %v1178_v56 = vsel %vm533_vm1, %v1173_v30, %v1177_v28  ;;  %v686_v28 = vshll.u32 %v4461_v5, 16 }
  0xc6   : > { %v1372_v53 = vpop.permute.xlu0 %1371  ;;  %877 = vrot.lane.b32.xlu1 %v842_v6, %s3707_s8  ;;  %v1699_v6 = vshll.u32 %v4430_v47, 16  ;;  %v688_v60 = vrot.slane %v686_v28, 1  ;;  %v844_v28 = vrot.slane %v4461_v5, 1  ;;  %v4564_v5 = vld [vmem:[%s3797_s30 + $0xb8] sm:$0xf] }
  0xc8   : > { %875 = vrot.lane.b32.xlu0 %v839_v61, %s3707_s8  ;;  %v4418_v13 = vpop.permute.xlu1 %1485  ;;  %v1701_v30 = vrot.slane %v1699_v6, 1  ;;  %v2862_v6 = vld [vmem:[%s3797_s30 + $0x9c] sm:$0xf] }
  0xca   : > { %v1484_v31 = vpop.permute.xlu0 %1483  ;;  %989 = vrot.lane.b32.xlu1 %v3025_v38, %s3705_s4  ;;  %v1950_v38 = vsel %vm1944_vm4, %v1917_v51, %v4365_v59 }
  0xcb   : > { %v1983_v46 = vsel %vm1977_vm5, %v1950_v38, %v4383_v36  ;;  %v1919_v36 = vsel %vm1911_vm3, %v3900_v34, %v4342_v29  ;;  %v1687_v34 = vshll.u32 %v4438_v41, 16 }
  0xcc   : > { %987 = vrot.lane.b32.xlu0 %v3024_v32, %s3705_s4  ;;  %v1758_v55 = vpop.permute.xlu1 %1757  ;;  %v2016_v59 = vsel %vm2010_vm6, %v1983_v46, %v1244_v1  ;;  %v681_v1 = vshll.u32 %v4441_v15, 16  ;;  %v1952_v61 = vsel %vm1944_vm4, %v1919_v36, %v4357_v21  ;;  %v266_v46 = vld [vmem:[%s3797_s30 + $0x9c] sm:$0xe] }
  0xcd   : > { %v2049_v10 = vsel %vm2043_vm7, %v2016_v59, %v1372_v53  ;;  %v1985_v29 = vsel %vm1977_vm5, %v1952_v61, %v4377_v42  ;;  %v1689_v50 = vrot.slane %v1687_v34, 1  ;;  %v4520_v59 = vld [vmem:[%s3797_s30 + $0xac] sm:$0xf] }
  0xce   : > { %v1756_v32 = vpop.permute.xlu0 %1755  ;;  %1261 = vrot.lane.b32.xlu1 %v1190_v54, %s3709_s26  ;;  %v2082_v14 = vsel %vm2076_vm8, %v2049_v10, %v1484_v31  ;;  %v2018_v3 = vsel %vm2010_vm6, %v1985_v29, %v4390_v48  ;;  %v683_v31 = vrot.slane %v681_v1, 1  ;;  %v693_v48 = vshll.u32 %v4470_v11, 16 }
  0xcf   : > { %v2115_v53 = vsel %vm2109_vm9, %v2082_v14, %v1756_v32  ;;  %v2051_v42 = vsel %vm2043_vm7, %v2018_v3, %v4404_v12  ;;  %v1685_v12 = vor.u32 %v1684_v0, %v1680_v25  ;;  %v4527_v25 = vld [vmem:[%s3797_s30 + $0xa0] sm:$0xf]  ;;  %v3011_v10 = vcombine.low %v266_v46, %v4449_v20 }
  0xd0   : > { %1259 = vrot.lane.b32.xlu0 %v1178_v56, %s3709_s26  ;;  %v4475_v2 = vpop.permute.xlu1 %734  ;;  %v2084_v33 = vsel %vm2076_vm8, %v2051_v42, %v4418_v13  ;;  %v3105_v56 = vcombine.low %v2961_v27, %v4399_v57  ;;  %v1702_v13 = vsel %vm533_vm1, %v1697_v58, %v1701_v30  ;;  %v684_v9 = vor.u32 %v683_v31, %v679_v19  ;;  %v4554_v42 = vld [vmem:[%s3797_s30 + $0xa4] ss:$0 sps:$4 sm:$0x11]  }
  0xd1   : > { %v2117_v51 = vsel %vm2109_vm9, %v2084_v33, %v1758_v55  ;;  %v691_v55 = vshrl.u32 %v4470_v11, 16  ;;  %v695_v45 = vrot.slane %v693_v48, 1  ;;  %v698_v57 = vshll.u32 %v4494_v18, 16  ;;  %v2898_v33 = vld [vmem:[%s3797_s30 + $0x9c] sm:$0xe] }
  0xd2   : > { %v1884_v16 = vpop.permute.xlu0 %1883  ;;  %1389 = vrot.lane.b32.xlu1 %v1354_v23, %s3706_s7  ;;  %v1861_v23 = vrot.slane %v3104_v43, 1  ;;  %v1864_v36 = vrot.slane %v3105_v56, 1  ;;  %v689_v1 = vsel %vm533_vm1, %v684_v9, %v688_v60  ;;  %v3027_v14 = vcombine.low %v2864_v49, %v4520_v59 }
  0xd3   : > { %v2148_v21 = vsel %vm2142_vm10, %v2115_v53, %v1884_v16  ;;  %v696_v41 = vor.u32 %v695_v45, %v691_v55  ;;  %v700_v61 = vrot.slane %v698_v57, 1  ;;  %v1865_v29 = vrot.slane %v4430_v47, 1  ;;  %v2926_v45 = vld [vmem:[%s3797_s30 + $0xa8] sm:$0xf]  ;;  %v4573_v57 = vld [vmem:[%s3797_s30 + $0xac] sm:$0xf] }
  0xd4   : > { %1387 = vrot.lane.b32.xlu0 %v1351_v7, %s3706_s7  ;;  %3333 = vmatprep.mubr.msk.bf16.mxu0 %vm2211_vm11, %v2148_v21  ;;  %v4499_v37 = vpop.permute.xlu1 %736  ;;  %v265_v7 = vld [vmem:[%s3797_s30 + $0x90] sm:$0xe]  ;;  %v1863_v34 = vsel %vm806_vm0, %v1861_v23, %v1862_v62  ;;  %v3026_v20 = vcombine.low %v2862_v6, %v4527_v25  ;;  %v846_v58 = vrot.slane %v3011_v10, 1  ;;  %v847_v3 = vrot.slane %v4494_v18, 1  ;;  %v2899_v18 = vld [vmem:[%s3797_s30 + $0xa8] sm:$0xe] }
  0xd5   : > { %v3010_v53 = vcombine.low %v265_v7, %v4425_v35  ;;  %v701_v44 = vsel %vm533_vm1, %v696_v41, %v700_v61  ;;  %v4547_v21 = vld [vmem:[%s3797_s30 + $0xb0] ss:$0 sps:$4 sm:$0x11]   ;;  %v1206_v47 = vshll.u32 %v3027_v14, 16  ;;  %v1866_v27 = vsel %vm806_vm0, %v1864_v36, %v1865_v29  ;;  %v233_v36 = vld [vmem:[%s3797_s30 + $0xa8] sm:$0xf] }
  0xd6   : > { %v1886_v54 = vpop.permute.xlu0 %1885  ;;  %1501 = vrot.lane.b32.xlu1 %v4409_v17, %s3710_s27  ;;  %v1690_v17 = vsel %vm533_vm1, %v1685_v12, %v1689_v50  ;;  %v1194_v19 = vshll.u32 %v3026_v20, 16  ;;  %v1204_v48 = vshrl.u32 %v3027_v14, 16  ;;  %v848_v43 = vsel %vm806_vm0, %v846_v58, %v847_v3  ;;  %v4588_v10 = vld [vmem:[%s3797_s30 + $0xac] sm:$0xf] }
  0xd7   : > { %v2150_v38 = vsel %vm2142_vm10, %v2117_v51, %v1886_v54  ;;  %v843_v30 = vrot.slane %v3010_v53, 1  ;;  %v1208_v12 = vrot.slane %v1206_v47, 1  ;;  %v1211_v50 = vshll.u32 %v4547_v21, 16  ;;  %v2928_v51 = vld [vmem:[%s3797_s30 + $0xb4] sm:$0xf] }
  0xd8   : > { %1499 = vrot.lane.b32.xlu0 %v4421_v24, %s3710_s27  ;;  %3334 = vmatmul.mubr.msk.bf16.gmra.mrb[4].mxu0 %vm2211_vm11, %v2150_v38  ;;  %v4514_v32 = vpop.permute.xlu1 %865  ;;  %v1192_v56 = vshrl.u32 %v3026_v20, 16  ;;  %v1199_v60 = vshll.u32 %v4554_v42, 16  ;;  %v3059_v55 = vcombine.low %v2899_v18, %v4520_v59  ;;  %v3058_v46 = vcombine.low %v2898_v33, %v4527_v25  ;;  %v4592_v61 = vld [vmem:[%s3797_s30 + $0xbc] ss:$0 sps:$4 sm:$0x11]  }
  0xd9   : > { %v845_v38 = vsel %vm806_vm0, %v843_v30, %v844_v28  ;;  %v1209_v23 = vor.u32 %v1208_v12, %v1204_v48  ;;  %v1213_v62 = vrot.slane %v1211_v50, 1  ;;  %v4584_v6 = vcombine.low %v2926_v45, %v4573_v57  ;;  %v4603_v3 = vld [vmem:[%s3797_s30 + $0xb0] ss:$0 sps:$4 sm:$0x11]   ;;  %v235_v28 = vld [vmem:[%s3797_s30 + $0xb4] sm:$0xf] }
  0xda   : > { %v4522_v24 = vpop.permute.xlu0 %863  ;;  %1773 = vrot.lane.b32.xlu1 %v1702_v13, %s3711_s28  ;;  %v1196_v13 = vrot.slane %v1194_v19, 1  ;;  %v1201_v59 = vrot.slane %v1199_v60, 1  ;;  %v1358_v25 = vrot.slane %v3059_v55, 1  ;;  %v1359_v41 = vrot.slane %v4547_v21, 1 }
  0xdb   : > { %v1356_v29 = vrot.slane %v4554_v42, 1  ;;  %v1214_v58 = vsel %vm533_vm1, %v1209_v23, %v1213_v62  ;;  %v4606_v21 = vcombine.low %v233_v36, %v4588_v10  ;;  %v1706_v30 = vshll.u32 %v4584_v6, 16 }
  0xdc   : > { %1771 = vrot.lane.b32.xlu0 %v1690_v17, %s3711_s28  ;;  %v4534_v0 = vpop.permute.xlu1 %977  ;;  %v4578_v17 = vcombine.low %v2928_v51, %v4564_v5  ;;  %v1197_v7 = vor.u32 %v1196_v13, %v1192_v56  ;;  %v1360_v42 = vsel %vm806_vm0, %v1358_v25, %v1359_v41  ;;  %v1723_v48 = vshll.u32 %v4592_v61, 16  ;;  %v4659_v25 = vld [vmem:[%s3797_s30 + $0xbc] ss:$0 sps:$4 sm:$0x11]  }
  0xdd   : > { %v1704_v12 = vshrl.u32 %v4584_v6, 16  ;;  %v705_v51 = vshll.u32 %v4606_v21, 16  ;;  %v1708_v55 = vrot.slane %v1706_v30, 1  ;;  %v703_v36 = vshrl.u32 %v4606_v21, 16 }
  0xde   : > { %v4540_v16 = vpop.permute.xlu0 %975  ;;  %750 = vrot.lane.b32.xlu1 %v689_v1, %s3708_s19  ;;  %v1718_v53 = vshll.u32 %v4578_v17, 16  ;;  %v1716_v19 = vshrl.u32 %v4578_v17, 16  ;;  %v1868_v30 = vrot.slane %v4603_v3, 1 }
  0xe0   : > { %1899 = vrot.lane.b32.xlu0 %v1863_v34, %s3712_s29  ;;  %v4549_v35 = vpop.permute.xlu1 %1249  ;;  %v1355_v34 = vrot.slane %v3058_v46, 1  ;;  %v1725_v46 = vrot.slane %v1723_v48, 1 }
  0xe2   : > { %v1248_v31 = vpop.permute.xlu0 %1247  ;;  %752 = vrot.lane.b32.xlu1 %v701_v44, %s3708_s19  ;;  %v1921_v44 = vsel %vm1911_vm3, %v3964_v52, %v4475_v2  ;;  %v4614_v52 = vld [vmem:[%s3797_s30 + $0xb8] sm:$0xf]  ;;  %v1357_v33 = vsel %vm806_vm0, %v1355_v34, %v1356_v29 }
  0xe4   : > { %1901 = vrot.lane.b32.xlu0 %v1866_v27, %s3712_s29  ;;  %v4566_v54 = vpop.permute.xlu1 %1377  ;;  %v1202_v27 = vsel %vm533_vm1, %v1197_v7, %v1201_v59 }
  0xe6   : > { %v1376_v9 = vpop.permute.xlu0 %1375  ;;  %881 = vrot.lane.b32.xlu1 %v848_v43, %s3707_s8  ;;  %v1720_v43 = vrot.slane %v1718_v53, 1 }
  0xe8   : > { %879 = vrot.lane.b32.xlu0 %v845_v38, %s3707_s8  ;;  %v4581_v49 = vpop.permute.xlu1 %1489  ;;  %v2962_v38 = vld [vmem:[%s3797_s30 + $0xa8] sm:$0xe]  ;;  %v1721_v7 = vor.u32 %v1720_v43, %v1716_v19  ;;  %v2866_v43 = vld [vmem:[%s3797_s30 + $0xb4] sm:$0xf] }
  0xe9   : > { %v3106_v59 = vcombine.low %v2962_v38, %v4573_v57  ;;  %v1709_v57 = vor.u32 %v1708_v55, %v1704_v12  ;;  %v4692_v12 = vld [vmem:[%s3797_s30 + $0xb8] sm:$0xf] }
  0xea   : > { %v1488_v1 = vpop.permute.xlu0 %1487  ;;  %993 = vrot.lane.b32.xlu1 %v3027_v14, %s3705_s4  ;;  %v1954_v14 = vsel %vm1944_vm4, %v1921_v44, %v4522_v24  ;;  %v4622_v24 = vld [vmem:[%s3797_s30 + $0xb0] ss:$0 sps:$4 sm:$0x11]  }
  0xeb   : > { %v1987_v2 = vsel %vm1977_vm5, %v1954_v14, %v4540_v16  ;;  %v1923_v16 = vsel %vm1911_vm3, %v3978_v63, %v4499_v37  ;;  %v1711_v63 = vshll.u32 %v4603_v3, 16  ;;  %v710_v23 = vshll.u32 %v4622_v24, 16  ;;  %v2868_v3 = vld [vmem:[%s3797_s30 + $0xc0] sm:$0xf] }
  0xec   : > { %991 = vrot.lane.b32.xlu0 %v3026_v20, %s3705_s4  ;;  %v1762_v47 = vpop.permute.xlu1 %1761  ;;  %v2020_v18 = vsel %vm2010_vm6, %v1987_v2, %v1248_v31  ;;  %v4636_v31 = vcombine.low %v235_v28, %v4614_v52  ;;  %v1956_v56 = vsel %vm1944_vm4, %v1923_v16, %v4514_v32 }
  0xed   : > { %v2053_v50 = vsel %vm2043_vm7, %v2020_v18, %v1376_v9  ;;  %v1989_v37 = vsel %vm1977_vm5, %v1956_v56, %v4534_v0  ;;  %v1713_v29 = vrot.slane %v1711_v63, 1  ;;  %v712_v44 = vrot.slane %v710_v23, 1  ;;  %v4685_v18 = vld [vmem:[%s3797_s30 + $0xc4] sm:$0xf] }
  0xee   : > { %v1760_v20 = vpop.permute.xlu0 %1759  ;;  %1265 = vrot.lane.b32.xlu1 %v1214_v58, %s3709_s26  ;;  %v2086_v13 = vsel %vm2076_vm8, %v2053_v50, %v1488_v1  ;;  %v2022_v32 = vsel %vm2010_vm6, %v1989_v37, %v4549_v35  ;;  %v707_v1 = vrot.slane %v705_v51, 1  ;;  %v717_v35 = vshll.u32 %v4636_v31, 16  ;;  %v2963_v58 = vld [vmem:[%s3797_s30 + $0xb4] sm:$0xe] }
  0xef   : > { %v2119_v9 = vsel %vm2109_vm9, %v2086_v13, %v1760_v20  ;;  %v2055_v0 = vsel %vm2043_vm7, %v2022_v32, %v4566_v54  ;;  %v715_v28 = vshrl.u32 %v4636_v31, 16  ;;  %v722_v20 = vshll.u32 %v4659_v25, 16  ;;  %v3583_v32 = vld [vmem:[%s3797_s30 + $0xc8] ss:$0 sps:$4 sm:$0x11]  }
  0xf0   : > { %1263 = vrot.lane.b32.xlu0 %v1202_v27, %s3709_s26  ;;  %v4641_v60 = vpop.permute.xlu1 %738  ;;  %v2088_v41 = vsel %vm2076_vm8, %v2055_v0, %v4581_v49  ;;  %v1726_v27 = vsel %vm533_vm1, %v1721_v7, %v1725_v46  ;;  %v1867_v49 = vrot.slane %v3106_v59, 1  ;;  %v719_v2 = vrot.slane %v717_v35, 1  ;;  %v3584_v0 = vld [vmem:[%s3797_s30 + $0xbc] ss:$0 sps:$4 sm:$0x11]  }
  0xf1   : > { %v2121_v54 = vsel %vm2109_vm9, %v2088_v41, %v1762_v47  ;;  %v708_v47 = vor.u32 %v707_v1, %v703_v36  ;;  %v1714_v19 = vsel %vm533_vm1, %v1709_v57, %v1713_v29  ;;  %v3107_v48 = vcombine.low %v2963_v58, %v4564_v5  ;;  %v2901_v35 = vld [vmem:[%s3797_s30 + $0xc0] sm:$0xe] }
  0xf2   : > { %v1888_v45 = vpop.permute.xlu0 %1887  ;;  %1393 = vrot.lane.b32.xlu1 %v1360_v42, %s3706_s7  ;;  %v1869_v16 = vsel %vm806_vm0, %v1867_v49, %v1868_v30  ;;  %v720_v51 = vor.u32 %v719_v2, %v715_v28  ;;  %v724_v38 = vrot.slane %v722_v20, 1  ;;  %v3029_v56 = vcombine.low %v2868_v3, %v4685_v18  ;;  %v4725_v49 = vld [vmem:[%s3797_s30 + $0xd0] sm:$0xf]  ;;  %v4729_v28 = vld [vmem:[%s3797_s30 + $0xc4] sm:$0xf] }
  0xf3   : > { %v2152_v62 = vsel %vm2142_vm10, %v2119_v9, %v1888_v45  ;;  %v713_v5 = vsel %vm533_vm1, %v708_v47, %v712_v44  ;;  %v1870_v55 = vrot.slane %v3107_v48, 1  ;;  %v1871_v63 = vrot.slane %v4592_v61, 1  ;;  %v2930_v47 = vld [vmem:[%s3797_s30 + $0xc0] sm:$0xf] }
  0xf4   : > { %1391 = vrot.lane.b32.xlu0 %v1357_v33, %s3706_s7  ;;  %3337 = vmatprep.mubr.msk.bf16.mxu0 %vm2211_vm11, %v2152_v62  ;;  %v4664_v34 = vpop.permute.xlu1 %740  ;;  %v3028_v9 = vcombine.low %v2866_v43, %v4692_v12  ;;  %v725_v45 = vsel %vm533_vm1, %v720_v51, %v724_v38  ;;  %v853_v23 = vrot.slane %v4659_v25, 1  ;;  %v1230_v62 = vshll.u32 %v3029_v56, 16  ;;  %v2900_v25 = vld [vmem:[%s3797_s30 + $0xb4] sm:$0xe] }
  0xf5   : > { %v850_v59 = vrot.slane %v4622_v24, 1  ;;  %v1228_v57 = vshrl.u32 %v3029_v56, 16  ;;  %v3061_v2 = vcombine.low %v2901_v35, %v4685_v18  ;;  %v3060_v20 = vcombine.low %v2900_v25, %v4692_v12 }
  0xf6   : > { %v1890_v53 = vpop.permute.xlu0 %1889  ;;  %1505 = vrot.lane.b32.xlu1 %v4578_v17, %s3710_s27  ;;  %v268_v17 = vld [vmem:[%s3797_s30 + $0xb4] sm:$0xe]  ;;  %v1218_v36 = vshll.u32 %v3028_v9, 16  ;;  %v1232_v29 = vrot.slane %v1230_v62, 1  ;;  %v1216_v58 = vshrl.u32 %v3028_v9, 16  ;;  %v1365_v51 = vrot.slane %v3583_v32, 1 }
  0xf7   : > { %v2154_v14 = vsel %vm2142_vm10, %v2121_v54, %v1890_v53  ;;  %v3013_v50 = vcombine.low %v268_v17, %v4614_v52  ;;  %v1235_v54 = vshll.u32 %v3583_v32, 16  ;;  %v2932_v53 = vld [vmem:[%s3797_s30 + $0xcc] sm:$0xf]  ;;  %v1364_v18 = vrot.slane %v3061_v2, 1 }
  0xf8   : > { %1503 = vrot.lane.b32.xlu0 %v4584_v6, %s3710_s27  ;;  %3338 = vmatmul.mubr.msk.bf16.gmra.mrb[8].mxu0 %vm2211_vm11, %v2154_v14  ;;  %v4679_v42 = vpop.permute.xlu1 %869  ;;  %v267_v6 = vld [vmem:[%s3797_s30 + $0xa8] sm:$0xe]  ;;  %v1220_v14 = vrot.slane %v1218_v36, 1  ;;  %v1233_v17 = vor.u32 %v1232_v29, %v1228_v57  ;;  %v3077_v48 = vcombine.low %v2932_v53, %v4725_v49  ;;  %v1361_v12 = vrot.slane %v3060_v20, 1  ;;  %v2965_v29 = vld [vmem:[%s3797_s30 + $0xcc] sm:$0xe] }
  0xf9   : > { %v3012_v37 = vcombine.low %v267_v6, %v4588_v10  ;;  %v852_v46 = vrot.slane %v3013_v50, 1  ;;  %v1872_v10 = vsel %vm806_vm0, %v1870_v55, %v1871_v63  ;;  %v1362_v38 = vrot.slane %v3584_v0, 1  ;;  %v2964_v53 = vld [vmem:[%s3797_s30 + $0xc0] sm:$0xe] }
  0xfa   : > { %v4687_v33 = vpop.permute.xlu0 %867  ;;  %1777 = vrot.lane.b32.xlu1 %v1726_v27, %s3711_s28  ;;  %v1223_v27 = vshll.u32 %v3584_v0, 16  ;;  %v1221_v6 = vor.u32 %v1220_v14, %v1216_v58  ;;  %v1925_v55 = vsel %vm1911_vm3, %v4040_v22, %v4641_v60  ;;  %v1366_v60 = vsel %vm806_vm0, %v1364_v18, %v1365_v51 }
  0xfb   : > { %v849_v7 = vrot.slane %v3012_v37, 1  ;;  %v854_v41 = vsel %vm806_vm0, %v852_v46, %v853_v23  ;;  %v1742_v37 = vshll.u32 %v3077_v48, 16  ;;  %v3108_v20 = vcombine.low %v2964_v53, %v4729_v28 }
  0xfc   : > { %1775 = vrot.lane.b32.xlu0 %v1714_v19, %s3711_s28  ;;  %v4700_v13 = vpop.permute.xlu1 %981  ;;  %v1237_v19 = vrot.slane %v1235_v54, 1  ;;  %v1225_v43 = vrot.slane %v1223_v27, 1  ;;  %v3109_v27 = vcombine.low %v2965_v29, %v4725_v49 }
  0xfd   : > { %v851_v24 = vsel %vm806_vm0, %v849_v7, %v850_v59  ;;  %v1740_v7 = vshrl.u32 %v3077_v48, 16  ;;  %v1927_v59 = vsel %vm1911_vm3, %v4061_v39, %v4664_v34  ;;  %v1744_v0 = vrot.slane %v1742_v37, 1 }
  0xfe   : > { %v980_v52 = vpop.permute.xlu0 %979  ;;  %754 = vrot.lane.b32.xlu1 %v713_v5, %s3708_s19  ;;  %v4738_v5 = vld [vmem:[%s3797_s30 + $0xd4] ss:$0 sps:$4 sm:$0x11]   ;;  %v1238_v63 = vsel %vm533_vm1, %v1233_v17, %v1237_v19  ;;  %v1226_v23 = vsel %vm533_vm1, %v1221_v6, %v1225_v43  ;;  %v1876_v6 = vrot.slane %v3109_v27, 1 }
  0xff   : > { %v1745_v14 = vor.u32 %v1744_v0, %v1740_v7 }
 0x100   : > { %1903 = vrot.lane.b32.xlu0 %v1869_v16, %s3712_s29  ;;  %v4710_v61 = vpop.permute.xlu1 %1253  ;;  %v3076_v16 = vcombine.low %v2930_v47, %v4729_v28  ;;  %v1873_v28 = vrot.slane %v3108_v20, 1 }
 0x102   : > { %v1252_v1 = vpop.permute.xlu0 %1251  ;;  %756 = vrot.lane.b32.xlu1 %v725_v45, %s3708_s19  ;;  %v1958_v45 = vsel %vm1944_vm4, %v1925_v55, %v4687_v33  ;;  %v1730_v62 = vshll.u32 %v3076_v16, 16  ;;  %v1747_v33 = vshll.u32 %v4738_v5, 16  ;;  %v1728_v36 = vshrl.u32 %v3076_v16, 16 }
 0x103   : > { %v1991_v32 = vsel %vm1977_vm5, %v1958_v45, %v980_v52 }
 0x104   : > { %1905 = vrot.lane.b32.xlu0 %v1872_v10, %s3712_s29  ;;  %v4721_v44 = vpop.permute.xlu1 %1381  ;;  %v2024_v22 = vsel %vm2010_vm6, %v1991_v32, %v1252_v1  ;;  %v1960_v1 = vsel %vm1944_vm4, %v1927_v59, %v4679_v42 }
 0x105   : > { %v1993_v54 = vsel %vm1977_vm5, %v1960_v1, %v4700_v13  ;;  %v1749_v13 = vrot.slane %v1747_v33, 1 }
 0x106   : > { %v1380_v30 = vpop.permute.xlu0 %1379  ;;  %885 = vrot.lane.b32.xlu1 %v854_v41, %s3707_s8  ;;  %v1732_v41 = vrot.slane %v1730_v62, 1 }
 0x107   : > { %v2057_v52 = vsel %vm2043_vm7, %v2024_v22, %v1380_v30  ;;  %v1750_v49 = vsel %vm533_vm1, %v1745_v14, %v1749_v13 }
 0x108   : > { %883 = vrot.lane.b32.xlu0 %v851_v24, %s3707_s8  ;;  %v1494_v3 = vpop.permute.xlu1 %1493  ;;  %v2026_v24 = vsel %vm2010_vm6, %v1993_v54, %v4710_v61  ;;  %v1733_v2 = vor.u32 %v1732_v41, %v1728_v36 }
 0x109   : > { %v2059_v42 = vsel %vm2043_vm7, %v2026_v24, %v4721_v44 }
 0x10a   : > { %v1492_v50 = vpop.permute.xlu0 %1491  ;;  %997 = vrot.lane.b32.xlu1 %v3029_v56, %s3705_s4  ;;  %v3590_v56 = vld [vmem:[%s3797_s30 + $0xc8] ss:$0 sps:$4 sm:$0x11]   ;;  %v2092_v30 = vsel %vm2076_vm8, %v2059_v42, %v1494_v3  ;;  %v1877_v3 = vrot.slane %v4738_v5, 1  ;;  %s4855_s30 = sand.u32 1, %s3687_s13  }
 0x10b   : > { %v2090_v35 = vsel %vm2076_vm8, %v2057_v52, %v1492_v50  ;;  %v1735_v57 = vshll.u32 %v3590_v56, 16  ;;  %v1874_v18 = vrot.slane %v3590_v56, 1  ;;  %s2836_s8 = sshll.u32 %s4855_s30, 1  ;;  %s2681_s23 = scalar_lea.sflag [#allocation3], %s4855_s30 }
 0x10c   : > { %995 = vrot.lane.b32.xlu0 %v3028_v9, %s3705_s4  ;;  %v1766_v46 = vpop.permute.xlu1 %1765  ;;  %v1363_v9 = vsel %vm806_vm0, %v1361_v12, %v1362_v38  ;;  %s2835_s4 = sshll.u32 %s4855_s30, 7  ;;  %s4889_s9 = scalar_lea.vmem [#allocation4], %s2836_s8 }
 0x10d   : > { %v1737_v61 = vrot.slane %v1735_v57, 1  ;;  %v2125_v17 = vsel %vm2109_vm9, %v2092_v30, %v1766_v46  ;;  %v1875_v12 = vsel %vm806_vm0, %v1873_v28, %v1874_v18 }
 0x10e   : > { %v1764_v10 = vpop.permute.xlu0 %1763  ;;  %1269 = vrot.lane.b32.xlu1 %v1238_v63, %s3709_s26 }
 0x10f   : > { %v2123_v39 = vsel %vm2109_vm9, %v2090_v35, %v1764_v10  ;;  %v1738_v50 = vsel %vm533_vm1, %v1733_v2, %v1737_v61 }
 0x110   : > { %1267 = vrot.lane.b32.xlu0 %v1226_v23, %s3709_s26  ;;  %v743_v25 = vpop.permute.xlu1 %742 }
 0x111   : > { %v1929_v23 = vsel %vm1911_vm3, %v4144_v8, %v743_v25 }
 0x112   : > { %v1892_v34 = vpop.permute.xlu0 %1891  ;;  %1397 = vrot.lane.b32.xlu1 %v1366_v60, %s3706_s7 }
 0x113   : > { %v2156_v58 = vsel %vm2142_vm10, %v2123_v39, %v1892_v34 }
 0x114   : > { %1395 = vrot.lane.b32.xlu0 %v1363_v9, %s3706_s7  ;;  %3341 = vmatprep.mubr.msk.bf16.mxu0 %vm2211_vm11, %v2156_v58  ;;  %v745_v47 = vpop.permute.xlu1 %744  ;;  %s4872_s7 = scalar_lea.vmem [#allocation2], %s2835_s4 }
 0x115   : > { %v1931_v22 = vsel %vm1911_vm3, %v4161_v26, %v745_v47  ;;  %s2702_s11 = sshll.u32 %s4872_s7, 4  ;;  %s4905_s11 = int_to_ptr.vmem [resolvable:$true] %s2702_s11 }
 0x116   : > { %v1894_v19 = vpop.permute.xlu0 %1893  ;;  %1509 = vrot.lane.b32.xlu1 %v3077_v48, %s3710_s27  ;;  %v1878_v48 = vsel %vm806_vm0, %v1876_v6, %v1877_v3  ;;  %s3593_s26 = scalar_lea.vmem %s4905_s11, 2048 }
 0x117   : > { %v2158_v44 = vsel %vm2142_vm10, %v2125_v17, %v1894_v19  ;;  %p3594_p12 = scmp.ne.s32.totalorder %s4905_s11, %s3593_s26 }
 0x118   : > { %1507 = vrot.lane.b32.xlu0 %v3076_v16, %s3710_s27  ;;  %3342 = vmatmul.mubr.msk.bf16.gmra.mrb[12].mxu0 %vm2211_vm11, %v2158_v44  ;;  %v874_v43 = vpop.permute.xlu1 %873  ;;  %s3714_s27 = smov [#allocation2]  }
 0x119   : > { %v1964_v9 = vsel %vm1944_vm4, %v1931_v22, %v874_v43  ;;  %p3595_p13 = pnand %p3594_p12, %p3777_p4 }
 0x11a   : > { %v872_v51 = vpop.permute.xlu0 %871  ;;  %1781 = vrot.lane.b32.xlu1 %v1750_v49, %s3711_s28 }
 0x11b   : > { %v1962_v56 = vsel %vm1944_vm4, %v1929_v23, %v872_v51  ;;  %p3596_p0 = pneg %p3595_p13 }
 0x11c   : > { %1779 = vrot.lane.b32.xlu0 %v1738_v50, %s3711_s28  ;;  %v986_v16 = vpop.permute.xlu1 %985  ;;  %s3597_s28 = sshll.u32 %s3714_s27, 4  ;;  %s3598_s28 = int_to_ptr.vmem [resolvable:$false] %s3597_s28 }
 0x11d   : > { %v1997_v8 = vsel %vm1977_vm5, %v1964_v9, %v986_v16  ;;  %s3599_s5 = scalar_lea.vmem %s3598_s28, 4096  ;;  %p3600_p1 = scmp.lt.s32.totalorder %s4905_s11, %s3598_s28 }
 0x11e   : > { %v984_v38 = vpop.permute.xlu0 %983  ;;  %1909 = vrot.lane.b32.xlu1 %v1878_v48, %s3712_s29  ;;  %p3601_p2 = scmp.lt.s32.totalorder %s3599_s5, %s3593_s26 }
 0x11f   : > { %v1995_v32 = vsel %vm1977_vm5, %v1962_v56, %v984_v38 }
 0x120   : > { %1907 = vrot.lane.b32.xlu0 %v1875_v12, %s3712_s29  ;;  %v1258_v5 = vpop.permute.xlu1 %1257  ;;  %p3602_p3 = por %p3601_p2, %p3600_p1 }
 0x121   : > { %v2030_v36 = vsel %vm2010_vm6, %v1997_v8, %v1258_v5 }
 0x122   : > { %v1256_v55 = vpop.permute.xlu0 %1255  ;;  %p3603_p5 = pnand %p3602_p3, %p3596_p0 }
 0x123   : > { %v2028_v7 = vsel %vm2010_vm6, %v1995_v32, %v1256_v55 }
 0x124   : > { %v1386_v63 = vpop.permute.xlu1 %1385 }
 0x125   : > { %v2063_v35 = vsel %vm2043_vm7, %v2030_v36, %v1386_v63 }
 0x126   : > { %v1384_v37 = vpop.permute.xlu0 %1383 }
 0x127   : > { %v2061_v60 = vsel %vm2043_vm7, %v2028_v7, %v1384_v37 }
 0x128   : > { %v1498_v45 = vpop.permute.xlu1 %1497 }
 0x129   : > { %v2096_v26 = vsel %vm2076_vm8, %v2063_v35, %v1498_v45 }
 0x12a   : > { %v1496_v46 = vpop.permute.xlu0 %1495 }
 0x12b   : > { %v2094_v33 = vsel %vm2076_vm8, %v2061_v60, %v1496_v46 }
 0x12c   : > { %v1770_v62 = vpop.permute.xlu1 %1769 }
 0x12d   : > { %v2129_v41 = vsel %vm2109_vm9, %v2096_v26, %v1770_v62 }
 0x12e   : > { %v1768_v10 = vpop.permute.xlu0 %1767 }
 0x12f   : > { %v2127_v52 = vsel %vm2109_vm9, %v2094_v33, %v1768_v10 }
 0x130   : > { %v747_v59 = vpop.permute.xlu1 %746 }
 0x131   : > { %v1933_v30 = vsel %vm1911_vm3, %v4293_v4, %v747_v59 }
 0x132   : > { %v1896_v0 = vpop.permute.xlu0 %1895 }
 0x133   : > { %v2160_v1 = vsel %vm2142_vm10, %v2127_v52, %v1896_v0 }
 0x134   : > { %3345 = vmatprep.mubr.msk.bf16.mxu1 %vm2211_vm11, %v2160_v1  ;;  %v749_v25 = vpop.permute.xlu1 %748 }
 0x135   : > { %v1935_v19 = vsel %vm1911_vm3, %v4317_v40, %v749_v25 }
 0x136   : > { %v1898_v57 = vpop.permute.xlu0 %1897 }
 0x137   : > { %v2162_v29 = vsel %vm2142_vm10, %v2129_v41, %v1898_v57 }
 0x138   : > { %3346 = vmatmul.mubr.msk.bf16.vlgmr.msra.gmra.mrb[0].mxu1 %vm2211_vm11, %v2162_v29  ;;  %v878_v54 = vpop.permute.xlu1 %877 }
 0x139   : > { %v1968_v49 = vsel %vm1944_vm4, %v1935_v19, %v878_v54 }
 0x13a   : > { %v876_v39 = vpop.permute.xlu0 %875 }
 0x13b   : > { %v1966_v47 = vsel %vm1944_vm4, %v1933_v30, %v876_v39 }
 0x13c   : > { %v990_v34 = vpop.permute.xlu1 %989 }
 0x13d   : > { %v2001_v4 = vsel %vm1977_vm5, %v1968_v49, %v990_v34 }
 0x13e   : > { %v988_v53 = vpop.permute.xlu0 %987 }
 0x13f   : > { %v1999_v61 = vsel %vm1977_vm5, %v1966_v47, %v988_v53 }
 0x140   : > { %v1262_v24 = vpop.permute.xlu1 %1261 }
 0x141   : > { %v2034_v28 = vsel %vm2010_vm6, %v2001_v4, %v1262_v24 }
 0x142   : > { %v1260_v58 = vpop.permute.xlu0 %1259 }
 0x143   : > { %v2032_v17 = vsel %vm2010_vm6, %v1999_v61, %v1260_v58 }
 0x144   : > { %v1390_v42 = vpop.permute.xlu1 %1389 }
 0x145   : > { %v2067_v51 = vsel %vm2043_vm7, %v2034_v28, %v1390_v42 }
 0x146   : > { %v1388_v14 = vpop.permute.xlu0 %1387 }
 0x147   : > { %v2065_v44 = vsel %vm2043_vm7, %v2032_v17, %v1388_v14 }
 0x148   : > { %v1502_v13 = vpop.permute.xlu1 %1501 }
 0x149   : > { %v2100_v40 = vsel %vm2076_vm8, %v2067_v51, %v1502_v13 }
 0x14a   : > { %v1500_v27 = vpop.permute.xlu0 %1499 }
 0x14b   : > { %v2098_v6 = vsel %vm2076_vm8, %v2065_v44, %v1500_v27 }
 0x14c   : > { %v1774_v2 = vpop.permute.xlu1 %1773 }
 0x14d   : > { %v2133_v16 = vsel %vm2109_vm9, %v2100_v40, %v1774_v2 }
 0x14e   : > { %v1772_v20 = vpop.permute.xlu0 %1771 }
 0x14f   : > { %v2131_v43 = vsel %vm2109_vm9, %v2098_v6, %v1772_v20 }
 0x150   : > { %v751_v3 = vpop.permute.xlu1 %750 }
 0x151   : > { %v1937_v10 = vsel %vm1911_vm3, %v4441_v15, %v751_v3 }
 0x152   : > { %v1900_v50 = vpop.permute.xlu0 %1899 }
 0x153   : > { %v2164_v18 = vsel %vm2142_vm10, %v2131_v43, %v1900_v50 }
 0x154   : > { %3349 = vmatprep.mubr.msk.bf16.mxu1 %vm2211_vm11, %v2164_v18  ;;  %v753_v48 = vpop.permute.xlu1 %752 }
 0x155   : > { %v1939_v59 = vsel %vm1911_vm3, %v4470_v11, %v753_v48 }
 0x156   : > { %v1902_v12 = vpop.permute.xlu0 %1901 }
 0x157   : > { %v2166_v38 = vsel %vm2142_vm10, %v2133_v16, %v1902_v12 }
 0x158   : > { %3350 = vmatmul.mubr.msk.bf16.gmra.mrb[4].mxu1 %vm2211_vm11, %v2166_v38  ;;  %v882_v5 = vpop.permute.xlu1 %881 }
 0x159   : > { %v1972_v52 = vsel %vm1944_vm4, %v1939_v59, %v882_v5 }
 0x15a   : > { %v880_v55 = vpop.permute.xlu0 %879 }
 0x15b   : > { %v1970_v7 = vsel %vm1944_vm4, %v1937_v10, %v880_v55 }
 0x15c   : > { %v994_v63 = vpop.permute.xlu1 %993 }
 0x15d   : > { %v2005_v15 = vsel %vm1977_vm5, %v1972_v52, %v994_v63 }
 0x15e   : > { %v992_v37 = vpop.permute.xlu0 %991 }
 0x15f   : > { %v2003_v60 = vsel %vm1977_vm5, %v1970_v7, %v992_v37 }
 0x160   : > { %v1266_v45 = vpop.permute.xlu1 %1265 }
 0x161   : > { %v2038_v26 = vsel %vm2010_vm6, %v2005_v15, %v1266_v45 }
 0x162   : > { %v1264_v46 = vpop.permute.xlu0 %1263 }
 0x163   : > { %v2036_v33 = vsel %vm2010_vm6, %v2003_v60, %v1264_v46 }
 0x164   : > { %v1394_v23 = vpop.permute.xlu1 %1393 }
 0x165   : > { %v2071_v41 = vsel %vm2043_vm7, %v2038_v26, %v1394_v23 }
 0x166   : > { %v1392_v56 = vpop.permute.xlu0 %1391 }
 0x167   : > { %v2069_v8 = vsel %vm2043_vm7, %v2036_v33, %v1392_v56 }
 0x168   : > { %v1506_v62 = vpop.permute.xlu1 %1505 }
 0x169   : > { %v2104_v11 = vsel %vm2076_vm8, %v2071_v41, %v1506_v62 }
 0x16a   : > { %v1504_v32 = vpop.permute.xlu0 %1503 }
 0x16b   : > { %v2102_v0 = vsel %vm2076_vm8, %v2069_v8, %v1504_v32 }
 0x16c   : > { %v1778_v22 = vpop.permute.xlu1 %1777 }
 0x16d   : > { %v2137_v29 = vsel %vm2109_vm9, %v2104_v11, %v1778_v22 }
 0x16e   : > { %v1776_v9 = vpop.permute.xlu0 %1775 }
 0x16f   : > { %v2135_v1 = vsel %vm2109_vm9, %v2102_v0, %v1776_v9 }
 0x170   : > { %v755_v36 = vpop.permute.xlu1 %754 }
 0x171   : > { %v1941_v47 = vsel %vm1911_vm3, %v4606_v21, %v755_v36 }
 0x172   : > { %v1904_v35 = vpop.permute.xlu0 %1903 }
 0x173   : > { %v2168_v25 = vsel %vm2142_vm10, %v2135_v1, %v1904_v35 }
 0x174   : > { %3353 = vmatprep.mubr.msk.bf16.mxu1 %vm2211_vm11, %v2168_v25  ;;  %v757_v57 = vpop.permute.xlu1 %756 }
 0x175   : > { %v1943_v2 = vsel %vm1911_vm3, %v4636_v31, %v757_v57 }
 0x176   : > { %v1906_v54 = vpop.permute.xlu0 %1905 }
 0x177   : > { %v2170_v39 = vsel %vm2142_vm10, %v2137_v29, %v1906_v54 }
 0x178   : > { %3354 = vmatmul.mubr.msk.bf16.gmra.mrb[8].mxu1 %vm2211_vm11, %v2170_v39  ;;  %v886_v34 = vpop.permute.xlu1 %885 }
 0x179   : > { %v1976_v20 = vsel %vm1944_vm4, %v1943_v2, %v886_v34 }
 0x17a   : > { %v884_v53 = vpop.permute.xlu0 %883 }
 0x17b   : > { %v1974_v17 = vsel %vm1944_vm4, %v1941_v47, %v884_v53 }
 0x17c   : > { %v998_v24 = vpop.permute.xlu1 %997 }
 0x17d   : > { %v2009_v44 = vsel %vm1977_vm5, %v1976_v20, %v998_v24 }
 0x17e   : > { %v996_v58 = vpop.permute.xlu0 %995 }
 0x17f   : > { %v2007_v49 = vsel %vm1977_vm5, %v1974_v17, %v996_v58 }
 0x180   : > { %v1270_v42 = vpop.permute.xlu1 %1269 }
 0x181   : > { %v2042_v3 = vsel %vm2010_vm6, %v2009_v44, %v1270_v42 }
 0x182   : > { %v1268_v14 = vpop.permute.xlu0 %1267 }
 0x183   : > { %v2040_v4 = vsel %vm2010_vm6, %v2007_v49, %v1268_v14 }
 0x184   : > { %v1398_v13 = vpop.permute.xlu1 %1397 }
 0x185   : > { %v2075_v31 = vsel %vm2043_vm7, %v2042_v3, %v1398_v13 }
 0x186   : > { %v1396_v27 = vpop.permute.xlu0 %1395 }
 0x187   : > { %v2073_v50 = vsel %vm2043_vm7, %v2040_v4, %v1396_v27 }
 0x188   : > { %v1510_v30 = vpop.permute.xlu1 %1509 }
 0x189   : > { %v2108_v38 = vsel %vm2076_vm8, %v2075_v31, %v1510_v30 }
 0x18a   : > { %v1508_v61 = vpop.permute.xlu0 %1507 }
 0x18b   : > { %v3331_v19 = vpop.f32.mrb[0].mxu0  ;;  %v2106_v5 = vsel %vm2076_vm8, %v2073_v50, %v1508_v61 }
 0x18c   : > { %v2282_v6 = vpop.f32.mrb[1].mxu0  ;;  %v1782_v43 = vpop.permute.xlu1 %1781  ;;  %v2608_v55 = vmul.f32 %v3331_v19, %v3331_v19 }
 0x18d   : > { %v3332_v21 = vpop.f32.mrb[2].mxu0  ;;  %v2606_v40 = vmul.f32 %v2282_v6, %v2282_v6  ;;  %v2141_v63 = vsel %vm2109_vm9, %v2108_v38, %v1782_v43 }
 0x18e   : > { %v3211_v28 = vpack.c.bf16 %v3332_v21, %v3331_v19  ;;  %v2285_v18 = vpop.f32.mrb[3].mxu0  ;;  %v1780_v51 = vpop.permute.xlu0 %1779  ;;  %v2609_v32 = vmul.f32 %v3332_v21, %v3332_v21 }
 0x18f   : > { %v3206_v48 = vpack.c.bf16 %v2285_v18, %v2282_v6  ;;  %v2569_v16 = vadd.f32 %v2285_v18, %v2282_v6  ;;  %v2607_v12 = vmul.f32 %v2285_v18, %v2285_v18  ;;  %v2139_v23 = vsel %vm2109_vm9, %v2106_v5, %v1780_v51 }
 0x190   : > { %3283 = vst [vmem:[%s4872_s7 + $0x8] sm:$0xff] %v3211_v28   ;;  %v1910_v46 = vpop.permute.xlu1 %1909 }
 0x191   : > { %3207 = vst [vmem:[%s4872_s7] sm:$0xff] %v3206_v48   ;;  %v2570_v37 = vadd.f32 %v3331_v19, %v2569_v16  ;;  %v2638_v45 = vadd.f32 %v2607_v12, %v2606_v40  ;;  %v2174_v56 = vsel %vm2142_vm10, %v2141_v63, %v1910_v46 }
 0x192   : > { %v1908_v62 = vpop.permute.xlu0 %1907 }
 0x193   : > { %v2639_v10 = vadd.f32 %v2638_v45, %v2608_v55  ;;  %v2172_v7 = vsel %vm2142_vm10, %v2139_v23, %v1908_v62  ;;  %v2571_v22 = vadd.f32 %v3332_v21, %v2570_v37  ;;  %v3713_v45 = vmov 0.0  }
 0x194   : > { %3357 = vmatprep.mubr.msk.bf16.mxu1 %vm2211_vm11, %v2172_v7  ;;  %200 = vst [vmem:[%s4889_s9] sm:$0x3] %v3713_v45 }
 0x195   : > { %3358 = vmatmul.mubr.msk.bf16.gmra.mrb[12].mxu1 %vm2211_vm11, %v2174_v56  ;;  %v2640_v60 = vadd.f32 %v2639_v10, %v2609_v32 }
 0x1ab   : > { %v3335_v9 = vpop.f32.mrb[4].mxu0 }
 0x1ac   : > { %v2298_v33 = vpop.f32.mrb[5].mxu0  ;;  %v2612_v25 = vmul.f32 %v3335_v9, %v3335_v9 }
 0x1ad   : > { %v2572_v59 = vadd.f32 %v2571_v22, %v2298_v33  ;;  %v2610_v8 = vmul.f32 %v2298_v33, %v2298_v33  ;;  %v3336_v52 = vpop.f32.mrb[6].mxu0 }
 0x1ae   : > { %v3221_v0 = vpack.c.bf16 %v3336_v52, %v3335_v9  ;;  %v2301_v36 = vpop.f32.mrb[7].mxu0  ;;  %v2613_v57 = vmul.f32 %v3336_v52, %v3336_v52 }
 0x1af   : > { %v2641_v15 = vadd.f32 %v2640_v60, %v2610_v8  ;;  %v3216_v1 = vpack.c.bf16 %v2301_v36, %v2298_v33  ;;  %v2573_v35 = vadd.f32 %v2572_v59, %v2301_v36  ;;  %v2611_v26 = vmul.f32 %v2301_v36, %v2301_v36 }
 0x1b0   : > { %3285 = vst [vmem:[%s4872_s7 + $0x18] sm:$0xff] %v3221_v0  }
 0x1b1   : > { %3284 = vst [vmem:[%s4872_s7 + $0x10] sm:$0xff] %v3216_v1   ;;  %v2574_v41 = vadd.f32 %v3335_v9, %v2573_v35  ;;  %v2642_v11 = vadd.f32 %v2641_v15, %v2611_v26 }
 0x1b3   : > { %v2643_v29 = vadd.f32 %v2642_v11, %v2612_v25  ;;  %v2575_v54 = vadd.f32 %v3336_v52, %v2574_v41 }
 0x1b5   : > { %v2644_v39 = vadd.f32 %v2643_v29, %v2613_v57 }
 0x1cb   : > { %v3339_v34 = vpop.f32.mrb[8].mxu0 }
 0x1cc   : > { %v2314_v53 = vpop.f32.mrb[9].mxu0  ;;  %v2616_v61 = vmul.f32 %v3339_v34, %v3339_v34 }
 0x1cd   : > { %v2576_v24 = vadd.f32 %v2575_v54, %v2314_v53  ;;  %v2614_v58 = vmul.f32 %v2314_v53, %v2314_v53  ;;  %v3340_v42 = vpop.f32.mrb[10].mxu0 }
 0x1ce   : > { %v3231_v14 = vpack.c.bf16 %v3340_v42, %v3339_v34  ;;  %v2317_v13 = vpop.f32.mrb[11].mxu0  ;;  %v2617_v19 = vmul.f32 %v3340_v42, %v3340_v42 }
 0x1cf   : > { %v2645_v27 = vadd.f32 %v2644_v39, %v2614_v58  ;;  %v3226_v30 = vpack.c.bf16 %v2317_v13, %v2314_v53  ;;  %v2577_v47 = vadd.f32 %v2576_v24, %v2317_v13  ;;  %v2615_v2 = vmul.f32 %v2317_v13, %v2317_v13 }
 0x1d0   : > { %3287 = vst [vmem:[%s4872_s7 + $0x28] sm:$0xff] %v3231_v14  }
 0x1d1   : > { %3286 = vst [vmem:[%s4872_s7 + $0x20] sm:$0xff] %v3226_v30   ;;  %v2578_v20 = vadd.f32 %v3339_v34, %v2577_v47  ;;  %v2646_v17 = vadd.f32 %v2645_v27, %v2615_v2 }
 0x1d3   : > { %v2647_v44 = vadd.f32 %v2646_v17, %v2616_v61  ;;  %v2579_v49 = vadd.f32 %v3340_v42, %v2578_v20 }
 0x1d5   : > { %v2648_v6 = vadd.f32 %v2647_v44, %v2617_v19 }
 0x1eb   : > { %v3343_v3 = vpop.f32.mrb[12].mxu0 }
 0x1ec   : > { %v2330_v4 = vpop.f32.mrb[13].mxu0  ;;  %v2620_v16 = vmul.f32 %v3343_v3, %v3343_v3 }
 0x1ed   : > { %v2580_v21 = vadd.f32 %v2579_v49, %v2330_v4  ;;  %v2618_v43 = vmul.f32 %v2330_v4, %v2330_v4  ;;  %v3344_v31 = vpop.f32.mrb[14].mxu0 }
 0x1ee   : > { %v3241_v50 = vpack.c.bf16 %v3344_v31, %v3343_v3  ;;  %v2333_v28 = vpop.f32.mrb[15].mxu0  ;;  %v2621_v5 = vmul.f32 %v3344_v31, %v3344_v31 }
 0x1ef   : > { %v2649_v18 = vadd.f32 %v2648_v6, %v2618_v43  ;;  %v3236_v51 = vpack.c.bf16 %v2333_v28, %v2330_v4  ;;  %v2581_v40 = vadd.f32 %v2580_v21, %v2333_v28  ;;  %v2619_v48 = vmul.f32 %v2333_v28, %v2333_v28 }
 0x1f0   : > { %3289 = vst [vmem:[%s4872_s7 + $0x38] sm:$0xff] %v3241_v50  }
 0x1f1   : > { %3288 = vst [vmem:[%s4872_s7 + $0x30] sm:$0xff] %v3236_v51   ;;  %v2582_v12 = vadd.f32 %v3343_v3, %v2581_v40  ;;  %v2650_v38 = vadd.f32 %v2649_v18, %v2619_v48 }
 0x1f3   : > { %v2651_v55 = vadd.f32 %v2650_v38, %v2620_v16  ;;  %v2583_v63 = vadd.f32 %v3344_v31, %v2582_v12 }
 0x1f5   : > { %v2652_v37 = vadd.f32 %v2651_v55, %v2621_v5 }
 0x20b   : > { %v3347_v46 = vpop.f32.mrb[0].mxu1 }
 0x20c   : > { %v2346_v23 = vpop.f32.mrb[1].mxu1  ;;  %v2624_v59 = vmul.f32 %v3347_v46, %v3347_v46 }
 0x20d   : > { %v2584_v56 = vadd.f32 %v2583_v63, %v2346_v23  ;;  %v2622_v62 = vmul.f32 %v2346_v23, %v2346_v23  ;;  %v3348_v32 = vpop.f32.mrb[2].mxu1 }
 0x20e   : > { %v3251_v10 = vpack.c.bf16 %v3348_v32, %v3347_v46  ;;  %v2349_v7 = vpop.f32.mrb[3].mxu1  ;;  %v2625_v0 = vmul.f32 %v3348_v32, %v3348_v32 }
 0x20f   : > { %v2653_v22 = vadd.f32 %v2652_v37, %v2622_v62  ;;  %v3246_v60 = vpack.c.bf16 %v2349_v7, %v2346_v23  ;;  %v2585_v9 = vadd.f32 %v2584_v56, %v2349_v7  ;;  %v2623_v33 = vmul.f32 %v2349_v7, %v2349_v7 }
 0x210   : > { %3291 = vst [vmem:[%s4872_s7 + $0x48] sm:$0xff] %v3251_v10  }
 0x211   : > { %3290 = vst [vmem:[%s4872_s7 + $0x40] sm:$0xff] %v3246_v60   ;;  %v2586_v8 = vadd.f32 %v3347_v46, %v2585_v9  ;;  %v2654_v52 = vadd.f32 %v2653_v22, %v2623_v33 }
 0x213   : > { %v2655_v36 = vadd.f32 %v2654_v52, %v2624_v59  ;;  %v2587_v15 = vadd.f32 %v3348_v32, %v2586_v8 }
 0x215   : > { %v2656_v1 = vadd.f32 %v2655_v36, %v2625_v0 }
 0x22b   : > { %v3351_v35 = vpop.f32.mrb[4].mxu1 }
 0x22c   : > { %v2362_v26 = vpop.f32.mrb[5].mxu1  ;;  %v2628_v24 = vmul.f32 %v3351_v35, %v3351_v35 }
 0x22d   : > { %v2588_v25 = vadd.f32 %v2587_v15, %v2362_v26  ;;  %v2626_v41 = vmul.f32 %v2362_v26, %v2362_v26  ;;  %v3352_v11 = vpop.f32.mrb[6].mxu1 }
 0x22e   : > { %v3261_v57 = vpack.c.bf16 %v3352_v11, %v3351_v35  ;;  %v2365_v29 = vpop.f32.mrb[7].mxu1  ;;  %v2629_v14 = vmul.f32 %v3352_v11, %v3352_v11 }
 0x22f   : > { %v2657_v54 = vadd.f32 %v2656_v1, %v2626_v41  ;;  %v3256_v39 = vpack.c.bf16 %v2365_v29, %v2362_v26  ;;  %v2589_v34 = vadd.f32 %v2588_v25, %v2365_v29  ;;  %v2627_v53 = vmul.f32 %v2365_v29, %v2365_v29 }
 0x230   : > { %3293 = vst [vmem:[%s4872_s7 + $0x58] sm:$0xff] %v3261_v57  }
 0x231   : > { %3292 = vst [vmem:[%s4872_s7 + $0x50] sm:$0xff] %v3256_v39   ;;  %v2590_v58 = vadd.f32 %v3351_v35, %v2589_v34  ;;  %v2658_v42 = vadd.f32 %v2657_v54, %v2627_v53 }
 0x233   : > { %v2659_v13 = vadd.f32 %v2658_v42, %v2628_v24  ;;  %v2591_v27 = vadd.f32 %v3352_v11, %v2590_v58 }
 0x235   : > { %v2660_v30 = vadd.f32 %v2659_v13, %v2629_v14 }
 0x24b   : > { %v3355_v47 = vpop.f32.mrb[8].mxu1 }
 0x24c   : > { %v2378_v2 = vpop.f32.mrb[9].mxu1  ;;  %v2632_v21 = vmul.f32 %v3355_v47, %v3355_v47 }
 0x24d   : > { %v2592_v61 = vadd.f32 %v2591_v27, %v2378_v2  ;;  %v2630_v20 = vmul.f32 %v2378_v2, %v2378_v2  ;;  %v3356_v17 = vpop.f32.mrb[10].mxu1 }
 0x24e   : > { %v3271_v19 = vpack.c.bf16 %v3356_v17, %v3355_v47  ;;  %v2381_v44 = vpop.f32.mrb[11].mxu1  ;;  %v2633_v50 = vmul.f32 %v3356_v17, %v3356_v17 }
 0x24f   : > { %v2661_v49 = vadd.f32 %v2660_v30, %v2630_v20  ;;  %v3266_v6 = vpack.c.bf16 %v2381_v44, %v2378_v2  ;;  %v2593_v3 = vadd.f32 %v2592_v61, %v2381_v44  ;;  %v2631_v4 = vmul.f32 %v2381_v44, %v2381_v44 }
 0x250   : > { %3295 = vst [vmem:[%s4872_s7 + $0x68] sm:$0xff] %v3271_v19  }
 0x251   : > { %3294 = vst [vmem:[%s4872_s7 + $0x60] sm:$0xff] %v3266_v6   ;;  %v2594_v43 = vadd.f32 %v3355_v47, %v2593_v3  ;;  %v2662_v31 = vadd.f32 %v2661_v49, %v2631_v4 }
 0x253   : > { %v2663_v28 = vadd.f32 %v2662_v31, %v2632_v21  ;;  %v2595_v18 = vadd.f32 %v3356_v17, %v2594_v43 }
 0x255   : > { %v2664_v51 = vadd.f32 %v2663_v28, %v2633_v50 }
 0x268   : > { %v3359_v40 = vpop.f32.mrb[12].mxu1 }
 0x269   : > { %v2394_v48 = vpop.f32.mrb[13].mxu1  ;;  %v2636_v23 = vmul.f32 %v3359_v40, %v3359_v40 }
 0x26a   : > { %v2596_v16 = vadd.f32 %v2595_v18, %v2394_v48  ;;  %v2634_v12 = vmul.f32 %v2394_v48, %v2394_v48  ;;  %v3360_v38 = vpop.f32.mrb[14].mxu1 }
 0x26b   : > { %v3281_v5 = vpack.c.bf16 %v3360_v38, %v3359_v40  ;;  %v2397_v55 = vpop.f32.mrb[15].mxu1 }
 0x26c   : > { %v2665_v63 = vadd.f32 %v2664_v51, %v2634_v12  ;;  %v3276_v37 = vpack.c.bf16 %v2397_v55, %v2394_v48  ;;  %v2597_v45 = vadd.f32 %v2596_v16, %v2397_v55  ;;  %v2635_v46 = vmul.f32 %v2397_v55, %v2397_v55 }
 0x26d   : > { %3297 = vst [vmem:[%s4872_s7 + $0x78] sm:$0xff] %v3281_v5  }
 0x26e   : > { %3296 = vst [vmem:[%s4872_s7 + $0x70] sm:$0xff] %v3276_v37   ;;  %v2598_v56 = vadd.f32 %v3359_v40, %v2597_v45  ;;  %v2666_v62 = vadd.f32 %v2665_v63, %v2635_v46 }
 0x26f   : > { %3606 = shalt.err (!%p3603_p5)
}
 0x270   : > { %s3607_s6 = scalar_lea.hbm %s4903_s21, 2048  ;;  %s3611_s8 = scalar_lea.hbm %s4992_s2, 4096 }
 0x271   : > { %p3608_p6 = scmp.ne.s32.totalorder %s4903_s21, %s3607_s6  ;;  %p3612_p10 = scmp.lt.u32.totalorder %s4903_s21, %s4992_s2 }
 0x272   : > { %p3613_p11 = scmp.lt.u32.totalorder %s3611_s8, %s3607_s6  ;;  %p3615_p13 = scmp.lt.u32.totalorder %s3607_s6, %s4903_s21 }
 0x273   : > { %p3609_p7 = pnand %p3608_p6, %p3777_p4 }
 0x274   : > { %p3614_p12 = por %p3613_p11, %p3612_p10 }
 0x275   : > { %p3610_p9 = pneg %p3609_p7 }
 0x276   : > { %p3616_p0 = por %p3615_p13, %p3614_p12 }
 0x278   : > { %p3617_p1 = pnand %p3616_p0, %p3610_p9 }
 0x27a   : > { %3620 = shalt.err (!%p3617_p1)
}
 0x27b   : > { %s3715_s19 = smov 4   ;;  %v2637_v32 = vmul.f32 %v3360_v38, %v3360_v38  ;;  %v2599_v10 = vadd.f32 %v3360_v38, %v2598_v56  ;;  %v2667_v7 = vadd.f32 %v2666_v62, %v2636_v23  ;;  %vm2676_vm12 = vcmask 1040384   ;;  %v2675_v25 = vld [vmem:[%s4889_s9] sm:$0x3]  ;;  %s2686_s27 = scalar_lea.sflag [#allocation5], %s4855_s30 }
 0x27c   : > { %3374 = dma.vmem_to_hbm [thread:$0]  (%p3777_p4), %s4905_s11, 2048, %s4903_s21, %s2681_s23, %s3712_s29, %s3712_s29, %s3715_s19  }
 0x27d   : > { %v2600_v22 = vrot.slane %v2599_v10, 4  ;;  %v2668_v60 = vadd.f32 %v2667_v7, %v2637_v32  ;;  %s3167_s29 = sshll.u32 %s3695_s15, 5  ;;  %s2718_s11 = sshll.u32 %s4889_s9, 4  ;;  %s4943_s11 = int_to_ptr.vmem [resolvable:$true] %s2718_s11 }
 0x27e   : > { %s4941_s26 = scalar_lea.hbm %s4993_s3, %s3167_s29  ;;  %s3621_s28 = scalar_lea.vmem %s4943_s11, 32 }
 0x27f   : > { %v2601_v9 = vadd.f32 %v2600_v22, %v2599_v10  ;;  %v2669_v33 = vrot.slane %v2668_v60, 4  ;;  %p3622_p2 = scmp.ne.s32.totalorder %s4943_s11, %s3621_s28  ;;  %s3716_s15 = smov [#allocation4]  }
 0x280   : > { %s3625_s5 = sshll.u32 %s3716_s15, 4  ;;  %s3626_s5 = int_to_ptr.vmem [resolvable:$false] %s3625_s5 }
 0x281   : > { %v2602_v59 = vrot.slane %v2601_v9, 2  ;;  %v2670_v8 = vadd.f32 %v2669_v33, %v2668_v60  ;;  %p3623_p3 = pnand %p3622_p2, %p3777_p4  ;;  %s3627_s6 = scalar_lea.vmem %s3626_s5, 64 }
 0x282   : > { %p3628_p6 = scmp.lt.s32.totalorder %s4943_s11, %s3626_s5  ;;  %p3629_p7 = scmp.lt.s32.totalorder %s3627_s6, %s3621_s28 }
 0x283   : > { %v2603_v52 = vadd.f32 %v2602_v59, %v2601_v9  ;;  %v2671_v0 = vrot.slane %v2670_v8, 2  ;;  %p3624_p5 = pneg %p3623_p3 }
 0x284   : > { %p3630_p9 = por %p3629_p7, %p3628_p6 }
 0x285   : > { %v2604_v36 = vrot.slane %v2603_v52, 1  ;;  %v2672_v15 = vadd.f32 %v2671_v0, %v2670_v8 }
 0x286   : > { %p3631_p10 = pnand %p3630_p9, %p3624_p5 }
 0x287   : > { %v2673_v1 = vrot.slane %v2672_v15, 1  ;;  %v2605_v35 = vadd.f32 %v2604_v36, %v2603_v52 }
 0x289   : > { %v2674_v26 = vadd.f32 %v2673_v1, %v2672_v15 }
 0x28b   : > { %v2677_v41 = vsel %vm2676_vm12, %v2605_v35, %v2674_v26 }
 0x28c   : > { %v2678_v11 = vadd.f32 %v2677_v41, %v2675_v25 }
 0x28e   : > { %2679 = vst [vmem:[%s4889_s9] sm:$0x3] %v2678_v11 }
 0x28f   : > { %3634 = shalt.err (!%p3631_p10)
}
 0x290   : > { %s3635_s30 = scalar_lea.hbm %s4941_s26, 32  ;;  %s3639_s7 = scalar_lea.hbm %s4993_s3, 64 }
 0x291   : > { %p3636_p11 = scmp.ne.s32.totalorder %s4941_s26, %s3635_s30  ;;  %p3640_p0 = scmp.lt.u32.totalorder %s4941_s26, %s4993_s3 }
 0x292   : > { %p3641_p1 = scmp.lt.u32.totalorder %s3639_s7, %s3635_s30  ;;  %p3643_p3 = scmp.lt.u32.totalorder %s3635_s30, %s4941_s26 }
 0x293   : > { %p3637_p12 = pnand %p3636_p11, %p3777_p4 }
 0x294   : > { %p3642_p2 = por %p3641_p1, %p3640_p0 }
 0x295   : > { %p3638_p13 = pneg %p3637_p12 }
 0x296   : > { %p3644_p5 = por %p3643_p3, %p3642_p2 }
 0x298   : > { %p3645_p6 = pnand %p3644_p5, %p3638_p13 }
 0x29a   : > { %3648 = shalt.err (!%p3645_p6)
}
 0x29b   : > { %3375 = dma.vmem_to_hbm [thread:$0]  (%p3777_p4), %s4943_s11, 32, %s4941_s26, %s2686_s27  }
 0x29c PF: > { %p3385_p7 = scmp.ge.s32.totalorder %s3703_s17, 2  ;;  %s2730_s18 = sand.u32 1, %s3683_s12  }
 0x29d   : > { %s2731_s19 = scalar_lea.sflag [#allocation3], %s2730_s18 }
 0x29e   : > { %p3379_p9 = pnand %p3385_p7, %p3784_p8 }
 0x2a0   : > { %3674 = dma.done.wait (!%p3379_p9), %s2731_s19, 2048  }
 0x2a1   : > { %3676 = vsyncadd (!%p3379_p9), %s2731_s19, 4294965248  ;;  %s2740_s29 = scalar_lea.sflag [#allocation5], %s2730_s18 }
 0x2a2   : > { %3678 = dma.done.wait (!%p3379_p9), %s2740_s29, 32  }
 0x2a3   : > { %3680 = vsyncadd (!%p3379_p9), %s2740_s29, 4294967264  ;;  %s20_s17 = sadd.s32 1, %s3703_s17   ;;  %s4996_s12 = smov %s3687_s13 }
 0x2a4   : > { %p17_p10 = scmp.ge.s32.totalorder %s20_s17, 4   ;;  %s4997_s13 = smov %s3691_s14 }
 0x2a5   : > { %s4998_s14 = smov %s3790_s25  ;;  %s4999_s15 = smov %s3699_s16 }
 0x2a6   : > { %s5000_s16 = smov %s5002_s20  ;;  %19 = sbr.rel (!%p17_p10) target bundleno = 6 (0x6), region = 87 }
 0x2ad   :  { %2745 = vsyncpa [#allocation3], 1 }
 0x2ae   :  { %2747 = vsyncpa [#allocation3 + $0x1], 1 }
 0x2af   :  { %2748 = vsyncpa [#allocation5], 1 }
 0x2b0   :  { %2750 = vsyncpa [#allocation5 + $0x1], 1 }

</bundles_post_ra>
